<compile_context>
chip_gen: v6e
topology: v6e:2x2x1
jax: 0.10.0
libtpu: 0.0.40
codegen_flags: <defaults>
</compile_context>

<pallas_src>
import functools

import jax
import jax.numpy as jnp
from jax.experimental import pallas as pl
from jax.experimental.pallas import tpu as pltpu

EPS = 1e-5
H0_LOGICAL, H0_PAD = 100, 128
H1_LOGICAL, H1_PAD = 50, 64
OUT = 10
ACT_DTYPE = jnp.bfloat16          # storage dtype for the two wide intermediates


def _round_up(n, m):
    return ((n + m - 1) // m) * m


# ---------------------------------------------------------------------------
# Kernels
# ---------------------------------------------------------------------------

def _bn_scale_shift(sum_row, sq_row, gamma, beta, nb_inv):
    """Fold batch stats + affine into a single per-feature scale/shift (f32)."""
    mean = sum_row * nb_inv
    var = jnp.maximum(sq_row * nb_inv - mean * mean, 0.0)   # biased batch var
    scale = gamma * jax.lax.rsqrt(var + EPS)
    shift = beta - mean * scale
    return scale, shift


def linear_stats_kernel(x_ref, w_ref, h_ref, sum_ref, sq_ref):
    """h = x @ W (bf16 in, f32 acc); accumulate per-feature sum / sumsq."""
    @pl.when(pl.program_id(0) == 0)
    def _():
        sum_ref[...] = jnp.zeros_like(sum_ref)
        sq_ref[...] = jnp.zeros_like(sq_ref)

    h = jnp.dot(x_ref[...], w_ref[...], preferred_element_type=jnp.float32)
    h_ref[...] = h.astype(h_ref.dtype)          # bf16 store (halves HBM traffic)
    sum_ref[...] += jnp.sum(h, axis=0, keepdims=True)      # stats from exact f32
    sq_ref[...] += jnp.sum(h * h, axis=0, keepdims=True)


def bn_relu_linear_stats_kernel(h_ref, sum_ref, sq_ref, g_ref, b_ref, w_ref,
                                hn_ref, nsum_ref, nsq_ref, *, nb_inv):
    """a = relu(BN(h)); h_next = a @ W_next; accumulate next-layer stats."""
    @pl.when(pl.program_id(0) == 0)
    def _():
        nsum_ref[...] = jnp.zeros_like(nsum_ref)
        nsq_ref[...] = jnp.zeros_like(nsq_ref)

    scale, shift = _bn_scale_shift(sum_ref[...], sq_ref[...],
                                   g_ref[...], b_ref[...], nb_inv)
    h = h_ref[...].astype(jnp.float32)
    a = jnp.maximum(h * scale + shift, 0.0)
    hn = jnp.dot(a.astype(jnp.bfloat16), w_ref[...],
                 preferred_element_type=jnp.float32)
    hn_ref[...] = hn.astype(hn_ref.dtype)
    nsum_ref[...] += jnp.sum(hn, axis=0, keepdims=True)
    nsq_ref[...] += jnp.sum(hn * hn, axis=0, keepdims=True)


def bn_relu_logsoftmax_kernel(h_ref, sum_ref, sq_ref, g_ref, b_ref, out_ref,
                              *, nb_inv):
    """y = relu(BN(h)); out = log_softmax(y, axis=1)."""
    scale, shift = _bn_scale_shift(sum_ref[...], sq_ref[...],
                                   g_ref[...], b_ref[...], nb_inv)
    y = jnp.maximum(h_ref[...].astype(jnp.float32) * scale + shift, 0.0)
    m = jnp.max(y, axis=1, keepdims=True)
    z = y - m
    lse = jnp.log(jnp.sum(jnp.exp(z), axis=1, keepdims=True))
    out_ref[...] = z - lse


# ---------------------------------------------------------------------------
# pallas_call wrappers (one batch pass each, batch-tiled grid)
# ---------------------------------------------------------------------------

def _row_spec(tb, f):
    return pl.BlockSpec((tb, f), lambda i: (i, 0))


def _resident_spec(shape):
    return pl.BlockSpec(shape, lambda i: (0, 0))


def _linear_stats(x2d, w, tb):
    B, D = x2d.shape
    F = w.shape[1]
    return pl.pallas_call(
        linear_stats_kernel,
        out_shape=(jax.ShapeDtypeStruct((B, F), ACT_DTYPE),
                   jax.ShapeDtypeStruct((1, F), jnp.float32),
                   jax.ShapeDtypeStruct((1, F), jnp.float32)),
        grid_spec=pltpu.PrefetchScalarGridSpec(
            num_scalar_prefetch=0,
            grid=(B // tb,),
            in_specs=[_row_spec(tb, D), _resident_spec((D, F))],
            out_specs=[_row_spec(tb, F),
                       _resident_spec((1, F)), _resident_spec((1, F))]),
        compiler_params=pltpu.CompilerParams(
            dimension_semantics=("arbitrary",)),
    )(x2d, w)


def _bn_relu_linear_stats(h, s, q, g, b, w, tb, nb_inv, out_dtype):
    B, Fi = h.shape
    Fo = w.shape[1]
    return pl.pallas_call(
        functools.partial(bn_relu_linear_stats_kernel, nb_inv=nb_inv),
        out_shape=(jax.ShapeDtypeStruct((B, Fo), out_dtype),
                   jax.ShapeDtypeStruct((1, Fo), jnp.float32),
                   jax.ShapeDtypeStruct((1, Fo), jnp.float32)),
        grid_spec=pltpu.PrefetchScalarGridSpec(
            num_scalar_prefetch=0,
            grid=(B // tb,),
            in_specs=[_row_spec(tb, Fi),
                      _resident_spec((1, Fi)), _resident_spec((1, Fi)),
                      _resident_spec((1, Fi)), _resident_spec((1, Fi)),
                      _resident_spec((Fi, Fo))],
            out_specs=[_row_spec(tb, Fo),
                       _resident_spec((1, Fo)), _resident_spec((1, Fo))]),
        compiler_params=pltpu.CompilerParams(
            dimension_semantics=("arbitrary",)),
    )(h, s, q, g, b, w)


def _bn_relu_logsoftmax(h, s, q, g, b, tb, nb_inv):
    B, F = h.shape
    return pl.pallas_call(
        functools.partial(bn_relu_logsoftmax_kernel, nb_inv=nb_inv),
        out_shape=jax.ShapeDtypeStruct((B, F), jnp.float32),
        grid_spec=pltpu.PrefetchScalarGridSpec(
            num_scalar_prefetch=0,
            grid=(B // tb,),
            in_specs=[_row_spec(tb, F),
                      _resident_spec((1, F)), _resident_spec((1, F)),
                      _resident_spec((1, F)), _resident_spec((1, F))],
            out_specs=_row_spec(tb, F)),
        compiler_params=pltpu.CompilerParams(
            dimension_semantics=("parallel",)),
    )(h, s, q, g, b)


# ---------------------------------------------------------------------------
# Model wrapper + init
# ---------------------------------------------------------------------------

def _choose_tb(B):
    for tb in (1024, 512, 256, 128, 64, 32, 16, 8):
        if B % tb == 0:
            return tb
    return B  # whole-batch block (== full array dim) is always legal


def first_network_with_normalization(x_nchw, params, tb=None):
    """x_nchw: (B, C, H, W) float. Returns (B, 10) f32 log-probabilities."""
    B = x_nchw.shape[0]
    w0, g0, be0, w1, g1, be1, w2, g2, be2 = params

    x2d = x_nchw.reshape(B, -1).astype(jnp.bfloat16)      # x.view(-1, image_size)
    d_pad = w0.shape[0]
    if x2d.shape[1] != d_pad:                             # lane-pad input features
        x2d = jnp.pad(x2d, ((0, 0), (0, d_pad - x2d.shape[1])))

    if tb is None:
        tb = _choose_tb(B)
    assert B % tb == 0, "batch tile must divide the batch"
    nb_inv = 1.0 / float(B)

    h0, s0, q0 = _linear_stats(x2d, w0, tb)                                 # (B,128) bf16
    h1, s1, q1 = _bn_relu_linear_stats(h0, s0, q0, g0, be0, w1, tb, nb_inv,
                                       out_dtype=ACT_DTYPE)                 # (B,64) bf16
    h2, s2, q2 = _bn_relu_linear_stats(h1, s1, q1, g1, be1, w2, tb, nb_inv,
                                       out_dtype=jnp.float32)               # (B,10) f32
    return _bn_relu_logsoftmax(h2, s2, q2, g2, be2, tb, nb_inv)             # (B,10)


def init_params(key, image_size):
    """Torch-like init; weights stored transposed (in,out), zero-padded to
    lane-dense widths (image_size->mult of 128, 100->128, 50->64), cast to
    bf16 for the MXU.  Linear biases are omitted: training-mode BatchNorm
    cancels them exactly.  BatchNorm: gamma=1, beta=0 (fresh-module defaults)."""
    d_pad = _round_up(image_size, 128)
    specs = [
        # (fan_in_logical, fan_in_padded, fan_out_logical, fan_out_padded)
        (image_size, d_pad, H0_LOGICAL, H0_PAD),
        (H0_LOGICAL, H0_PAD, H1_LOGICAL, H1_PAD),
        (H1_LOGICAL, H1_PAD, OUT, OUT),
    ]
    params = []
    for i, (fi, fip, fo, fop) in enumerate(specs):
        kw = jax.random.fold_in(key, i)
        bound = 1.0 / jnp.sqrt(float(fi))
        w = jax.random.uniform(kw, (fi, fo), jnp.float32, -bound, bound)
        w_pad = jnp.zeros((fip, fop), jnp.float32).at[:fi, :fo].set(w)
        params.append(w_pad.astype(jnp.bfloat16))
        params.append(jnp.ones((1, fop), jnp.float32))    # gamma
        params.append(jnp.zeros((1, fop), jnp.float32))   # beta
    return tuple(params)


def _reference(x_nchw, params):
    """Pure-JAX reference mirroring the kernel's math / storage dtypes."""
    B = x_nchw.shape[0]
    w0, g0, be0, w1, g1, be1, w2, g2, be2 = params
    x2d = x_nchw.reshape(B, -1).astype(jnp.bfloat16)
    d_pad = w0.shape[0]
    if x2d.shape[1] != d_pad:
        x2d = jnp.pad(x2d, ((0, 0), (0, d_pad - x2d.shape[1])))

    def bn_relu(h_exact, h_stored, g, b):
        mean = jnp.mean(h_exact, axis=0, keepdims=True)
        var = jnp.maximum(
            jnp.mean(h_exact * h_exact, axis=0, keepdims=True) - mean * mean, 0.0)
        scale = g * jax.lax.rsqrt(var + EPS)
        return jnp.maximum(h_stored.astype(jnp.float32) * scale
                           + (b - mean * scale), 0.0)

    h0 = jnp.dot(x2d, w0, preferred_element_type=jnp.float32)
    a0 = bn_relu(h0, h0.astype(ACT_DTYPE), g0, be0)
    h1 = jnp.dot(a0.astype(jnp.bfloat16), w1, preferred_element_type=jnp.float32)
    a1 = bn_relu(h1, h1.astype(ACT_DTYPE), g1, be1)
    h2 = jnp.dot(a1.astype(jnp.bfloat16), w2, preferred_element_type=jnp.float32)
    y = bn_relu(h2, h2, g2, be2)
    return jax.nn.log_softmax(y, axis=1)


if __name__ == "__main__":
    key = jax.random.PRNGKey(0)
    B, C, H, W = 256, 1, 16, 16
    image_size = C * H * W                                  # 256

    kx, kp = jax.random.split(key)
    x = jax.random.normal(kx, (B, C, H, W), jnp.float32)
    params = init_params(kp, image_size)

    # tb=64 -> 4-step batch grid at this small demo shape (exercises tiling).
    fwd = jax.jit(first_network_with_normalization, static_argnames=("tb",))
    out = fwd(x, params, tb=64)
    out = jax.block_until_ready(out)

    assert out.shape == (B, OUT)
    assert bool(jnp.all(jnp.isfinite(out)))
    # log_softmax rows sum (in prob space) to ~1
    assert jnp.allclose(jnp.sum(jnp.exp(out), axis=1), 1.0, atol=1e-4)
    # match the pure-JAX reference (same bf16/f32 math)
    ref = _reference(x, params)
    assert jnp.allclose(out, ref, atol=5e-2, rtol=5e-2)
    print("KERNEL_OK")
</pallas_src>

<mosaic_0001>
module attributes {stable_mosaic.version = 11 : i64} {
  func.func @linear_stats_kernel(%arg0: i32, %arg1: memref<64x256xbf16, #tpu.memory_space<vmem>>, %arg2: memref<256x128xbf16, #tpu.memory_space<vmem>>, %arg3: memref<64x128xbf16, #tpu.memory_space<vmem>>, %arg4: memref<1x128xf32, #tpu.memory_space<vmem>>, %arg5: memref<1x128xf32, #tpu.memory_space<vmem>>) attributes {dimension_semantics = [#tpu.dimension_semantics<arbitrary>], iteration_bounds = array<i64: 4>, scalar_prefetch = 0 : i64, scratch_operands = 0 : i64, tpu.core_type = #tpu.core_type<tc>, window_params = [{transform_indices = @transform_0, window_bounds = array<i64: 64, 256>}, {pipeline_mode = #tpu.pipeline_mode<synchronous>, transform_indices = @transform_1, window_bounds = array<i64: 256, 128>}, {transform_indices = @transform_2, window_bounds = array<i64: 64, 128>}, {pipeline_mode = #tpu.pipeline_mode<synchronous>, transform_indices = @transform_3, window_bounds = array<i64: 1, 128>}, {pipeline_mode = #tpu.pipeline_mode<synchronous>, transform_indices = @transform_4, window_bounds = array<i64: 1, 128>}]} {
    %c0_i32 = arith.constant 0 : i32
    %0 = arith.cmpi eq, %arg0, %c0_i32 : i32
    %1 = arith.extui %0 : i1 to i32
    %c0_i32_0 = arith.constant 0 : i32
    %2 = arith.cmpi ne, %1, %c0_i32_0 : i32
    scf.if %2 {
      %cst_16 = arith.constant 0.000000e+00 : f32
      %19 = vector.broadcast %cst_16 : f32 to vector<1x128xf32>
      %c0_17 = arith.constant 0 : index
      %c0_18 = arith.constant 0 : index
      %20 = vector.load %arg4[%c0_17, %c0_18] : memref<1x128xf32, #tpu.memory_space<vmem>>, vector<1x128xf32>
      tpu.vector_store %arg4[%c0_17, %c0_18], %19 {strides = array<i32>} : memref<1x128xf32, #tpu.memory_space<vmem>>, vector<1x128xf32>,
      %cst_19 = arith.constant 0.000000e+00 : f32
      %21 = vector.broadcast %cst_19 : f32 to vector<1x128xf32>
      %c0_20 = arith.constant 0 : index
      %c0_21 = arith.constant 0 : index
      %22 = vector.load %arg5[%c0_20, %c0_21] : memref<1x128xf32, #tpu.memory_space<vmem>>, vector<1x128xf32>
      tpu.vector_store %arg5[%c0_20, %c0_21], %21 {strides = array<i32>} : memref<1x128xf32, #tpu.memory_space<vmem>>, vector<1x128xf32>,
    } else {
    }
    %c0 = arith.constant 0 : index
    %c0_1 = arith.constant 0 : index
    %3 = vector.load %arg1[%c0, %c0_1] : memref<64x256xbf16, #tpu.memory_space<vmem>>, vector<64x256xbf16>
    %c0_2 = arith.constant 0 : index
    %c0_3 = arith.constant 0 : index
    %4 = vector.load %arg2[%c0_2, %c0_3] : memref<256x128xbf16, #tpu.memory_space<vmem>>, vector<256x128xbf16>
    %cst = arith.constant dense<0.000000e+00> : vector<64x128xf32>
    %5 = tpu.matmul %3, %4, %cst {dimension_numbers = #tpu.dot_dimension_numbers<[1], [0], [0], [1], [0, 0, 1, 1], [], []>} : vector<64x256xbf16>, vector<256x128xbf16>, vector<64x128xf32> -> vector<64x128xf32>
    %6 = arith.truncf %5 : vector<64x128xf32> to vector<64x128xbf16>
    %c0_4 = arith.constant 0 : index
    %c0_5 = arith.constant 0 : index
    %7 = vector.load %arg3[%c0_4, %c0_5] : memref<64x128xbf16, #tpu.memory_space<vmem>>, vector<64x128xbf16>
    tpu.vector_store %arg3[%c0_4, %c0_5], %6 {strides = array<i32>} : memref<64x128xbf16, #tpu.memory_space<vmem>>, vector<64x128xbf16>,
    %c0_6 = arith.constant 0 : index
    %c0_7 = arith.constant 0 : index
    %8 = vector.load %arg4[%c0_6, %c0_7] : memref<1x128xf32, #tpu.memory_space<vmem>>, vector<1x128xf32>
    %cst_8 = arith.constant dense<0.000000e+00> : vector<128xf32>
    %9 = vector.multi_reduction <add>, %5, %cst_8 [0] : vector<64x128xf32> to vector<128xf32>
    %10 = vector.shape_cast %9 : vector<128xf32> to vector<1x128xf32>
    %11 = arith.addf %8, %10 : vector<1x128xf32>
    %c0_9 = arith.constant 0 : index
    %c0_10 = arith.constant 0 : index
    %12 = vector.load %arg4[%c0_9, %c0_10] : memref<1x128xf32, #tpu.memory_space<vmem>>, vector<1x128xf32>
    tpu.vector_store %arg4[%c0_9, %c0_10], %11 {strides = array<i32>} : memref<1x128xf32, #tpu.memory_space<vmem>>, vector<1x128xf32>,
    %c0_11 = arith.constant 0 : index
    %c0_12 = arith.constant 0 : index
    %13 = vector.load %arg5[%c0_11, %c0_12] : memref<1x128xf32, #tpu.memory_space<vmem>>, vector<1x128xf32>
    %14 = arith.mulf %5, %5 : vector<64x128xf32>
    %cst_13 = arith.constant dense<0.000000e+00> : vector<128xf32>
    %15 = vector.multi_reduction <add>, %14, %cst_13 [0] : vector<64x128xf32> to vector<128xf32>
    %16 = vector.shape_cast %15 : vector<128xf32> to vector<1x128xf32>
    %17 = arith.addf %13, %16 : vector<1x128xf32>
    %c0_14 = arith.constant 0 : index
    %c0_15 = arith.constant 0 : index
    %18 = vector.load %arg5[%c0_14, %c0_15] : memref<1x128xf32, #tpu.memory_space<vmem>>, vector<1x128xf32>
    tpu.vector_store %arg5[%c0_14, %c0_15], %17 {strides = array<i32>} : memref<1x128xf32, #tpu.memory_space<vmem>>, vector<1x128xf32>,
    return
  }
  func.func @transform_0(%arg0: i32) -> (i32, i32) {
    %c0_i32 = arith.constant 0 : i32
    %c0_i32_0 = arith.constant 0 : i32
    return %arg0, %c0_i32 : i32, i32
  }
  func.func @transform_1(%arg0: i32) -> (i32, i32) {
    %c0_i32 = arith.constant 0 : i32
    %c0_i32_0 = arith.constant 0 : i32
    %c0_i32_1 = arith.constant 0 : i32
    return %c0_i32, %c0_i32_0 : i32, i32
  }
  func.func @transform_2(%arg0: i32) -> (i32, i32) {
    %c0_i32 = arith.constant 0 : i32
    %c0_i32_0 = arith.constant 0 : i32
    return %arg0, %c0_i32 : i32, i32
  }
  func.func @transform_3(%arg0: i32) -> (i32, i32) {
    %c0_i32 = arith.constant 0 : i32
    %c0_i32_0 = arith.constant 0 : i32
    %c0_i32_1 = arith.constant 0 : i32
    return %c0_i32, %c0_i32_0 : i32, i32
  }
  func.func @transform_4(%arg0: i32) -> (i32, i32) {
    %c0_i32 = arith.constant 0 : i32
    %c0_i32_0 = arith.constant 0 : i32
    %c0_i32_1 = arith.constant 0 : i32
    return %c0_i32, %c0_i32_0 : i32, i32
  }
}

module attributes {stable_mosaic.version = 11 : i64} {
  func.func @bn_relu_linear_stats_kernel(%arg0: i32, %arg1: memref<64x64xbf16, #tpu.memory_space<vmem>>, %arg2: memref<1x64xf32, #tpu.memory_space<vmem>>, %arg3: memref<1x64xf32, #tpu.memory_space<vmem>>, %arg4: memref<1x64xf32, #tpu.memory_space<vmem>>, %arg5: memref<1x64xf32, #tpu.memory_space<vmem>>, %arg6: memref<64x10xbf16, #tpu.memory_space<vmem>>, %arg7: memref<64x10xf32, #tpu.memory_space<vmem>>, %arg8: memref<1x10xf32, #tpu.memory_space<vmem>>, %arg9: memref<1x10xf32, #tpu.memory_space<vmem>>) attributes {dimension_semantics = [#tpu.dimension_semantics<arbitrary>], iteration_bounds = array<i64: 4>, scalar_prefetch = 0 : i64, scratch_operands = 0 : i64, tpu.core_type = #tpu.core_type<tc>, window_params = [{transform_indices = @transform_0, window_bounds = array<i64: 64, 64>}, {pipeline_mode = #tpu.pipeline_mode<synchronous>, transform_indices = @transform_1, window_bounds = array<i64: 1, 64>}, {pipeline_mode = #tpu.pipeline_mode<synchronous>, transform_indices = @transform_2, window_bounds = array<i64: 1, 64>}, {pipeline_mode = #tpu.pipeline_mode<synchronous>, transform_indices = @transform_3, window_bounds = array<i64: 1, 64>}, {pipeline_mode = #tpu.pipeline_mode<synchronous>, transform_indices = @transform_4, window_bounds = array<i64: 1, 64>}, {pipeline_mode = #tpu.pipeline_mode<synchronous>, transform_indices = @transform_5, window_bounds = array<i64: 64, 10>}, {transform_indices = @transform_6, window_bounds = array<i64: 64, 10>}, {pipeline_mode = #tpu.pipeline_mode<synchronous>, transform_indices = @transform_7, window_bounds = array<i64: 1, 10>}, {pipeline_mode = #tpu.pipeline_mode<synchronous>, transform_indices = @transform_8, window_bounds = array<i64: 1, 10>}]} {
    %c0_i32 = arith.constant 0 : i32
    %0 = arith.cmpi eq, %arg0, %c0_i32 : i32
    %1 = arith.extui %0 : i1 to i32
    %c0_i32_0 = arith.constant 0 : i32
    %2 = arith.cmpi ne, %1, %c0_i32_0 : i32
    scf.if %2 {
      %cst_29 = arith.constant 0.000000e+00 : f32
      %44 = vector.broadcast %cst_29 : f32 to vector<1x10xf32>
      %c0_30 = arith.constant 0 : index
      %c0_31 = arith.constant 0 : index
      %45 = vector.load %arg8[%c0_30, %c0_31] : memref<1x10xf32, #tpu.memory_space<vmem>>, vector<1x10xf32>
      tpu.vector_store %arg8[%c0_30, %c0_31], %44 {strides = array<i32>} : memref<1x10xf32, #tpu.memory_space<vmem>>, vector<1x10xf32>,
      %cst_32 = arith.constant 0.000000e+00 : f32
      %46 = vector.broadcast %cst_32 : f32 to vector<1x10xf32>
      %c0_33 = arith.constant 0 : index
      %c0_34 = arith.constant 0 : index
      %47 = vector.load %arg9[%c0_33, %c0_34] : memref<1x10xf32, #tpu.memory_space<vmem>>, vector<1x10xf32>
      tpu.vector_store %arg9[%c0_33, %c0_34], %46 {strides = array<i32>} : memref<1x10xf32, #tpu.memory_space<vmem>>, vector<1x10xf32>,
    } else {
    }
    %c0 = arith.constant 0 : index
    %c0_1 = arith.constant 0 : index
    %3 = vector.load %arg2[%c0, %c0_1] : memref<1x64xf32, #tpu.memory_space<vmem>>, vector<1x64xf32>
    %c0_2 = arith.constant 0 : index
    %c0_3 = arith.constant 0 : index
    %4 = vector.load %arg3[%c0_2, %c0_3] : memref<1x64xf32, #tpu.memory_space<vmem>>, vector<1x64xf32>
    %c0_4 = arith.constant 0 : index
    %c0_5 = arith.constant 0 : index
    %5 = vector.load %arg4[%c0_4, %c0_5] : memref<1x64xf32, #tpu.memory_space<vmem>>, vector<1x64xf32>
    %c0_6 = arith.constant 0 : index
    %c0_7 = arith.constant 0 : index
    %6 = vector.load %arg5[%c0_6, %c0_7] : memref<1x64xf32, #tpu.memory_space<vmem>>, vector<1x64xf32>
    %cst = arith.constant 3.906250e-03 : f32
    %7 = vector.broadcast %cst : f32 to vector<1x64xf32>
    %8 = arith.mulf %3, %7 : vector<1x64xf32>
    %cst_8 = arith.constant 3.906250e-03 : f32
    %9 = vector.broadcast %cst_8 : f32 to vector<1x64xf32>
    %10 = arith.mulf %4, %9 : vector<1x64xf32>
    %11 = arith.mulf %8, %8 : vector<1x64xf32>
    %12 = arith.subf %10, %11 : vector<1x64xf32>
    %cst_9 = arith.constant 0.000000e+00 : f32
    %13 = vector.broadcast %cst_9 : f32 to vector<1x64xf32>
    %14 = arith.maximumf %12, %13 : vector<1x64xf32>
    %cst_10 = arith.constant 9.99999974E-6 : f32
    %15 = vector.broadcast %cst_10 : f32 to vector<1x64xf32>
    %16 = arith.addf %14, %15 : vector<1x64xf32>
    %17 = math.rsqrt %16 : vector<1x64xf32>
    %18 = arith.mulf %5, %17 : vector<1x64xf32>
    %19 = arith.mulf %8, %18 : vector<1x64xf32>
    %20 = arith.subf %6, %19 : vector<1x64xf32>
    %c0_11 = arith.constant 0 : index
    %c0_12 = arith.constant 0 : index
    %21 = vector.load %arg1[%c0_11, %c0_12] : memref<64x64xbf16, #tpu.memory_space<vmem>>, vector<64x64xbf16>
    %22 = arith.extf %21 : vector<64x64xbf16> to vector<64x64xf32>
    %23 = vector.broadcast %18 : vector<1x64xf32> to vector<64x64xf32>
    %24 = arith.mulf %22, %23 : vector<64x64xf32>
    %25 = vector.broadcast %20 : vector<1x64xf32> to vector<64x64xf32>
    %26 = arith.addf %24, %25 : vector<64x64xf32>
    %cst_13 = arith.constant 0.000000e+00 : f32
    %27 = vector.broadcast %cst_13 : f32 to vector<64x64xf32>
    %28 = arith.maximumf %26, %27 : vector<64x64xf32>
    %29 = arith.truncf %28 : vector<64x64xf32> to vector<64x64xbf16>
    %c0_14 = arith.constant 0 : index
    %c0_15 = arith.constant 0 : index
    %30 = vector.load %arg6[%c0_14, %c0_15] : memref<64x10xbf16, #tpu.memory_space<vmem>>, vector<64x10xbf16>
    %cst_16 = arith.constant dense<0.000000e+00> : vector<64x10xf32>
    %31 = tpu.matmul %29, %30, %cst_16 {dimension_numbers = #tpu.dot_dimension_numbers<[1], [0], [0], [1], [0, 0, 1, 1], [], []>} : vector<64x64xbf16>, vector<64x10xbf16>, vector<64x10xf32> -> vector<64x10xf32>
    %c0_17 = arith.constant 0 : index
    %c0_18 = arith.constant 0 : index
    %32 = vector.load %arg7[%c0_17, %c0_18] : memref<64x10xf32, #tpu.memory_space<vmem>>, vector<64x10xf32>
    tpu.vector_store %arg7[%c0_17, %c0_18], %31 {strides = array<i32>} : memref<64x10xf32, #tpu.memory_space<vmem>>, vector<64x10xf32>,
    %c0_19 = arith.constant 0 : index
    %c0_20 = arith.constant 0 : index
    %33 = vector.load %arg8[%c0_19, %c0_20] : memref<1x10xf32, #tpu.memory_space<vmem>>, vector<1x10xf32>
    %cst_21 = arith.constant dense<0.000000e+00> : vector<10xf32>
    %34 = vector.multi_reduction <add>, %31, %cst_21 [0] : vector<64x10xf32> to vector<10xf32>
    %35 = vector.shape_cast %34 : vector<10xf32> to vector<1x10xf32>
    %36 = arith.addf %33, %35 : vector<1x10xf32>
    %c0_22 = arith.constant 0 : index
    %c0_23 = arith.constant 0 : index
    %37 = vector.load %arg8[%c0_22, %c0_23] : memref<1x10xf32, #tpu.memory_space<vmem>>, vector<1x10xf32>
    tpu.vector_store %arg8[%c0_22, %c0_23], %36 {strides = array<i32>} : memref<1x10xf32, #tpu.memory_space<vmem>>, vector<1x10xf32>,
    %c0_24 = arith.constant 0 : index
    %c0_25 = arith.constant 0 : index
    %38 = vector.load %arg9[%c0_24, %c0_25] : memref<1x10xf32, #tpu.memory_space<vmem>>, vector<1x10xf32>
    %39 = arith.mulf %31, %31 : vector<64x10xf32>
    %cst_26 = arith.constant dense<0.000000e+00> : vector<10xf32>
    %40 = vector.multi_reduction <add>, %39, %cst_26 [0] : vector<64x10xf32> to vector<10xf32>
    %41 = vector.shape_cast %40 : vector<10xf32> to vector<1x10xf32>
    %42 = arith.addf %38, %41 : vector<1x10xf32>
    %c0_27 = arith.constant 0 : index
    %c0_28 = arith.constant 0 : index
    %43 = vector.load %arg9[%c0_27, %c0_28] : memref<1x10xf32, #tpu.memory_space<vmem>>, vector<1x10xf32>
    tpu.vector_store %arg9[%c0_27, %c0_28], %42 {strides = array<i32>} : memref<1x10xf32, #tpu.memory_space<vmem>>, vector<1x10xf32>,
    return
  }
  func.func @transform_0(%arg0: i32) -> (i32, i32) {
    %c0_i32 = arith.constant 0 : i32
    %c0_i32_0 = arith.constant 0 : i32
    return %arg0, %c0_i32 : i32, i32
  }
  func.func @transform_1(%arg0: i32) -> (i32, i32) {
    %c0_i32 = arith.constant 0 : i32
    %c0_i32_0 = arith.constant 0 : i32
    %c0_i32_1 = arith.constant 0 : i32
    return %c0_i32, %c0_i32_0 : i32, i32
  }
  func.func @transform_2(%arg0: i32) -> (i32, i32) {
    %c0_i32 = arith.constant 0 : i32
    %c0_i32_0 = arith.constant 0 : i32
    %c0_i32_1 = arith.constant 0 : i32
    return %c0_i32, %c0_i32_0 : i32, i32
  }
  func.func @transform_3(%arg0: i32) -> (i32, i32) {
    %c0_i32 = arith.constant 0 : i32
    %c0_i32_0 = arith.constant 0 : i32
    %c0_i32_1 = arith.constant 0 : i32
    return %c0_i32, %c0_i32_0 : i32, i32
  }
  func.func @transform_4(%arg0: i32) -> (i32, i32) {
    %c0_i32 = arith.constant 0 : i32
    %c0_i32_0 = arith.constant 0 : i32
    %c0_i32_1 = arith.constant 0 : i32
    return %c0_i32, %c0_i32_0 : i32, i32
  }
  func.func @transform_5(%arg0: i32) -> (i32, i32) {
    %c0_i32 = arith.constant 0 : i32
    %c0_i32_0 = arith.constant 0 : i32
    %c0_i32_1 = arith.constant 0 : i32
    return %c0_i32, %c0_i32_0 : i32, i32
  }
  func.func @transform_6(%arg0: i32) -> (i32, i32) {
    %c0_i32 = arith.constant 0 : i32
    %c0_i32_0 = arith.constant 0 : i32
    return %arg0, %c0_i32 : i32, i32
  }
  func.func @transform_7(%arg0: i32) -> (i32, i32) {
    %c0_i32 = arith.constant 0 : i32
    %c0_i32_0 = arith.constant 0 : i32
    %c0_i32_1 = arith.constant 0 : i32
    return %c0_i32, %c0_i32_0 : i32, i32
  }
  func.func @transform_8(%arg0: i32) -> (i32, i32) {
    %c0_i32 = arith.constant 0 : i32
    %c0_i32_0 = arith.constant 0 : i32
    %c0_i32_1 = arith.constant 0 : i32
    return %c0_i32, %c0_i32_0 : i32, i32
  }
}

module attributes {stable_mosaic.version = 11 : i64} {
  func.func @bn_relu_linear_stats_kernel(%arg0: i32, %arg1: memref<64x128xbf16, #tpu.memory_space<vmem>>, %arg2: memref<1x128xf32, #tpu.memory_space<vmem>>, %arg3: memref<1x128xf32, #tpu.memory_space<vmem>>, %arg4: memref<1x128xf32, #tpu.memory_space<vmem>>, %arg5: memref<1x128xf32, #tpu.memory_space<vmem>>, %arg6: memref<128x64xbf16, #tpu.memory_space<vmem>>, %arg7: memref<64x64xbf16, #tpu.memory_space<vmem>>, %arg8: memref<1x64xf32, #tpu.memory_space<vmem>>, %arg9: memref<1x64xf32, #tpu.memory_space<vmem>>) attributes {dimension_semantics = [#tpu.dimension_semantics<arbitrary>], iteration_bounds = array<i64: 4>, scalar_prefetch = 0 : i64, scratch_operands = 0 : i64, tpu.core_type = #tpu.core_type<tc>, window_params = [{transform_indices = @transform_0, window_bounds = array<i64: 64, 128>}, {pipeline_mode = #tpu.pipeline_mode<synchronous>, transform_indices = @transform_1, window_bounds = array<i64: 1, 128>}, {pipeline_mode = #tpu.pipeline_mode<synchronous>, transform_indices = @transform_2, window_bounds = array<i64: 1, 128>}, {pipeline_mode = #tpu.pipeline_mode<synchronous>, transform_indices = @transform_3, window_bounds = array<i64: 1, 128>}, {pipeline_mode = #tpu.pipeline_mode<synchronous>, transform_indices = @transform_4, window_bounds = array<i64: 1, 128>}, {pipeline_mode = #tpu.pipeline_mode<synchronous>, transform_indices = @transform_5, window_bounds = array<i64: 128, 64>}, {transform_indices = @transform_6, window_bounds = array<i64: 64, 64>}, {pipeline_mode = #tpu.pipeline_mode<synchronous>, transform_indices = @transform_7, window_bounds = array<i64: 1, 64>}, {pipeline_mode = #tpu.pipeline_mode<synchronous>, transform_indices = @transform_8, window_bounds = array<i64: 1, 64>}]} {
    %c0_i32 = arith.constant 0 : i32
    %0 = arith.cmpi eq, %arg0, %c0_i32 : i32
    %1 = arith.extui %0 : i1 to i32
    %c0_i32_0 = arith.constant 0 : i32
    %2 = arith.cmpi ne, %1, %c0_i32_0 : i32
    scf.if %2 {
      %cst_29 = arith.constant 0.000000e+00 : f32
      %45 = vector.broadcast %cst_29 : f32 to vector<1x64xf32>
      %c0_30 = arith.constant 0 : index
      %c0_31 = arith.constant 0 : index
      %46 = vector.load %arg8[%c0_30, %c0_31] : memref<1x64xf32, #tpu.memory_space<vmem>>, vector<1x64xf32>
      tpu.vector_store %arg8[%c0_30, %c0_31], %45 {strides = array<i32>} : memref<1x64xf32, #tpu.memory_space<vmem>>, vector<1x64xf32>,
      %cst_32 = arith.constant 0.000000e+00 : f32
      %47 = vector.broadcast %cst_32 : f32 to vector<1x64xf32>
      %c0_33 = arith.constant 0 : index
      %c0_34 = arith.constant 0 : index
      %48 = vector.load %arg9[%c0_33, %c0_34] : memref<1x64xf32, #tpu.memory_space<vmem>>, vector<1x64xf32>
      tpu.vector_store %arg9[%c0_33, %c0_34], %47 {strides = array<i32>} : memref<1x64xf32, #tpu.memory_space<vmem>>, vector<1x64xf32>,
    } else {
    }
    %c0 = arith.constant 0 : index
    %c0_1 = arith.constant 0 : index
    %3 = vector.load %arg2[%c0, %c0_1] : memref<1x128xf32, #tpu.memory_space<vmem>>, vector<1x128xf32>
    %c0_2 = arith.constant 0 : index
    %c0_3 = arith.constant 0 : index
    %4 = vector.load %arg3[%c0_2, %c0_3] : memref<1x128xf32, #tpu.memory_space<vmem>>, vector<1x128xf32>
    %c0_4 = arith.constant 0 : index
    %c0_5 = arith.constant 0 : index
    %5 = vector.load %arg4[%c0_4, %c0_5] : memref<1x128xf32, #tpu.memory_space<vmem>>, vector<1x128xf32>
    %c0_6 = arith.constant 0 : index
    %c0_7 = arith.constant 0 : index
    %6 = vector.load %arg5[%c0_6, %c0_7] : memref<1x128xf32, #tpu.memory_space<vmem>>, vector<1x128xf32>
    %cst = arith.constant 3.906250e-03 : f32
    %7 = vector.broadcast %cst : f32 to vector<1x128xf32>
    %8 = arith.mulf %3, %7 : vector<1x128xf32>
    %cst_8 = arith.constant 3.906250e-03 : f32
    %9 = vector.broadcast %cst_8 : f32 to vector<1x128xf32>
    %10 = arith.mulf %4, %9 : vector<1x128xf32>
    %11 = arith.mulf %8, %8 : vector<1x128xf32>
    %12 = arith.subf %10, %11 : vector<1x128xf32>
    %cst_9 = arith.constant 0.000000e+00 : f32
    %13 = vector.broadcast %cst_9 : f32 to vector<1x128xf32>
    %14 = arith.maximumf %12, %13 : vector<1x128xf32>
    %cst_10 = arith.constant 9.99999974E-6 : f32
    %15 = vector.broadcast %cst_10 : f32 to vector<1x128xf32>
    %16 = arith.addf %14, %15 : vector<1x128xf32>
    %17 = math.rsqrt %16 : vector<1x128xf32>
    %18 = arith.mulf %5, %17 : vector<1x128xf32>
    %19 = arith.mulf %8, %18 : vector<1x128xf32>
    %20 = arith.subf %6, %19 : vector<1x128xf32>
    %c0_11 = arith.constant 0 : index
    %c0_12 = arith.constant 0 : index
    %21 = vector.load %arg1[%c0_11, %c0_12] : memref<64x128xbf16, #tpu.memory_space<vmem>>, vector<64x128xbf16>
    %22 = arith.extf %21 : vector<64x128xbf16> to vector<64x128xf32>
    %23 = vector.broadcast %18 : vector<1x128xf32> to vector<64x128xf32>
    %24 = arith.mulf %22, %23 : vector<64x128xf32>
    %25 = vector.broadcast %20 : vector<1x128xf32> to vector<64x128xf32>
    %26 = arith.addf %24, %25 : vector<64x128xf32>
    %cst_13 = arith.constant 0.000000e+00 : f32
    %27 = vector.broadcast %cst_13 : f32 to vector<64x128xf32>
    %28 = arith.maximumf %26, %27 : vector<64x128xf32>
    %29 = arith.truncf %28 : vector<64x128xf32> to vector<64x128xbf16>
    %c0_14 = arith.constant 0 : index
    %c0_15 = arith.constant 0 : index
    %30 = vector.load %arg6[%c0_14, %c0_15] : memref<128x64xbf16, #tpu.memory_space<vmem>>, vector<128x64xbf16>
    %cst_16 = arith.constant dense<0.000000e+00> : vector<64x64xf32>
    %31 = tpu.matmul %29, %30, %cst_16 {dimension_numbers = #tpu.dot_dimension_numbers<[1], [0], [0], [1], [0, 0, 1, 1], [], []>} : vector<64x128xbf16>, vector<128x64xbf16>, vector<64x64xf32> -> vector<64x64xf32>
    %32 = arith.truncf %31 : vector<64x64xf32> to vector<64x64xbf16>
    %c0_17 = arith.constant 0 : index
    %c0_18 = arith.constant 0 : index
    %33 = vector.load %arg7[%c0_17, %c0_18] : memref<64x64xbf16, #tpu.memory_space<vmem>>, vector<64x64xbf16>
    tpu.vector_store %arg7[%c0_17, %c0_18], %32 {strides = array<i32>} : memref<64x64xbf16, #tpu.memory_space<vmem>>, vector<64x64xbf16>,
    %c0_19 = arith.constant 0 : index
    %c0_20 = arith.constant 0 : index
    %34 = vector.load %arg8[%c0_19, %c0_20] : memref<1x64xf32, #tpu.memory_space<vmem>>, vector<1x64xf32>
    %cst_21 = arith.constant dense<0.000000e+00> : vector<64xf32>
    %35 = vector.multi_reduction <add>, %31, %cst_21 [0] : vector<64x64xf32> to vector<64xf32>
    %36 = vector.shape_cast %35 : vector<64xf32> to vector<1x64xf32>
    %37 = arith.addf %34, %36 : vector<1x64xf32>
    %c0_22 = arith.constant 0 : index
    %c0_23 = arith.constant 0 : index
    %38 = vector.load %arg8[%c0_22, %c0_23] : memref<1x64xf32, #tpu.memory_space<vmem>>, vector<1x64xf32>
    tpu.vector_store %arg8[%c0_22, %c0_23], %37 {strides = array<i32>} : memref<1x64xf32, #tpu.memory_space<vmem>>, vector<1x64xf32>,
    %c0_24 = arith.constant 0 : index
    %c0_25 = arith.constant 0 : index
    %39 = vector.load %arg9[%c0_24, %c0_25] : memref<1x64xf32, #tpu.memory_space<vmem>>, vector<1x64xf32>
    %40 = arith.mulf %31, %31 : vector<64x64xf32>
    %cst_26 = arith.constant dense<0.000000e+00> : vector<64xf32>
    %41 = vector.multi_reduction <add>, %40, %cst_26 [0] : vector<64x64xf32> to vector<64xf32>
    %42 = vector.shape_cast %41 : vector<64xf32> to vector<1x64xf32>
    %43 = arith.addf %39, %42 : vector<1x64xf32>
    %c0_27 = arith.constant 0 : index
    %c0_28 = arith.constant 0 : index
    %44 = vector.load %arg9[%c0_27, %c0_28] : memref<1x64xf32, #tpu.memory_space<vmem>>, vector<1x64xf32>
    tpu.vector_store %arg9[%c0_27, %c0_28], %43 {strides = array<i32>} : memref<1x64xf32, #tpu.memory_space<vmem>>, vector<1x64xf32>,
    return
  }
  func.func @transform_0(%arg0: i32) -> (i32, i32) {
    %c0_i32 = arith.constant 0 : i32
    %c0_i32_0 = arith.constant 0 : i32
    return %arg0, %c0_i32 : i32, i32
  }
  func.func @transform_1(%arg0: i32) -> (i32, i32) {
    %c0_i32 = arith.constant 0 : i32
    %c0_i32_0 = arith.constant 0 : i32
    %c0_i32_1 = arith.constant 0 : i32
    return %c0_i32, %c0_i32_0 : i32, i32
  }
  func.func @transform_2(%arg0: i32) -> (i32, i32) {
    %c0_i32 = arith.constant 0 : i32
    %c0_i32_0 = arith.constant 0 : i32
    %c0_i32_1 = arith.constant 0 : i32
    return %c0_i32, %c0_i32_0 : i32, i32
  }
  func.func @transform_3(%arg0: i32) -> (i32, i32) {
    %c0_i32 = arith.constant 0 : i32
    %c0_i32_0 = arith.constant 0 : i32
    %c0_i32_1 = arith.constant 0 : i32
    return %c0_i32, %c0_i32_0 : i32, i32
  }
  func.func @transform_4(%arg0: i32) -> (i32, i32) {
    %c0_i32 = arith.constant 0 : i32
    %c0_i32_0 = arith.constant 0 : i32
    %c0_i32_1 = arith.constant 0 : i32
    return %c0_i32, %c0_i32_0 : i32, i32
  }
  func.func @transform_5(%arg0: i32) -> (i32, i32) {
    %c0_i32 = arith.constant 0 : i32
    %c0_i32_0 = arith.constant 0 : i32
    %c0_i32_1 = arith.constant 0 : i32
    return %c0_i32, %c0_i32_0 : i32, i32
  }
  func.func @transform_6(%arg0: i32) -> (i32, i32) {
    %c0_i32 = arith.constant 0 : i32
    %c0_i32_0 = arith.constant 0 : i32
    return %arg0, %c0_i32 : i32, i32
  }
  func.func @transform_7(%arg0: i32) -> (i32, i32) {
    %c0_i32 = arith.constant 0 : i32
    %c0_i32_0 = arith.constant 0 : i32
    %c0_i32_1 = arith.constant 0 : i32
    return %c0_i32, %c0_i32_0 : i32, i32
  }
  func.func @transform_8(%arg0: i32) -> (i32, i32) {
    %c0_i32 = arith.constant 0 : i32
    %c0_i32_0 = arith.constant 0 : i32
    %c0_i32_1 = arith.constant 0 : i32
    return %c0_i32, %c0_i32_0 : i32, i32
  }
}

module attributes {stable_mosaic.version = 11 : i64} {
  func.func @bn_relu_logsoftmax_kernel(%arg0: i32, %arg1: memref<64x10xf32, #tpu.memory_space<vmem>>, %arg2: memref<1x10xf32, #tpu.memory_space<vmem>>, %arg3: memref<1x10xf32, #tpu.memory_space<vmem>>, %arg4: memref<1x10xf32, #tpu.memory_space<vmem>>, %arg5: memref<1x10xf32, #tpu.memory_space<vmem>>, %arg6: memref<64x10xf32, #tpu.memory_space<vmem>>) attributes {dimension_semantics = [#tpu.dimension_semantics<parallel>], iteration_bounds = array<i64: 4>, scalar_prefetch = 0 : i64, scratch_operands = 0 : i64, tpu.core_type = #tpu.core_type<tc>, window_params = [{transform_indices = @transform_0, window_bounds = array<i64: 64, 10>}, {pipeline_mode = #tpu.pipeline_mode<synchronous>, transform_indices = @transform_1, window_bounds = array<i64: 1, 10>}, {pipeline_mode = #tpu.pipeline_mode<synchronous>, transform_indices = @transform_2, window_bounds = array<i64: 1, 10>}, {pipeline_mode = #tpu.pipeline_mode<synchronous>, transform_indices = @transform_3, window_bounds = array<i64: 1, 10>}, {pipeline_mode = #tpu.pipeline_mode<synchronous>, transform_indices = @transform_4, window_bounds = array<i64: 1, 10>}, {transform_indices = @transform_5, window_bounds = array<i64: 64, 10>}]} {
    %c0 = arith.constant 0 : index
    %c0_0 = arith.constant 0 : index
    %0 = vector.load %arg2[%c0, %c0_0] : memref<1x10xf32, #tpu.memory_space<vmem>>, vector<1x10xf32>
    %c0_1 = arith.constant 0 : index
    %c0_2 = arith.constant 0 : index
    %1 = vector.load %arg3[%c0_1, %c0_2] : memref<1x10xf32, #tpu.memory_space<vmem>>, vector<1x10xf32>
    %c0_3 = arith.constant 0 : index
    %c0_4 = arith.constant 0 : index
    %2 = vector.load %arg4[%c0_3, %c0_4] : memref<1x10xf32, #tpu.memory_space<vmem>>, vector<1x10xf32>
    %c0_5 = arith.constant 0 : index
    %c0_6 = arith.constant 0 : index
    %3 = vector.load %arg5[%c0_5, %c0_6] : memref<1x10xf32, #tpu.memory_space<vmem>>, vector<1x10xf32>
    %cst = arith.constant 3.906250e-03 : f32
    %4 = vector.broadcast %cst : f32 to vector<1x10xf32>
    %5 = arith.mulf %0, %4 : vector<1x10xf32>
    %cst_7 = arith.constant 3.906250e-03 : f32
    %6 = vector.broadcast %cst_7 : f32 to vector<1x10xf32>
    %7 = arith.mulf %1, %6 : vector<1x10xf32>
    %8 = arith.mulf %5, %5 : vector<1x10xf32>
    %9 = arith.subf %7, %8 : vector<1x10xf32>
    %cst_8 = arith.constant 0.000000e+00 : f32
    %10 = vector.broadcast %cst_8 : f32 to vector<1x10xf32>
    %11 = arith.maximumf %9, %10 : vector<1x10xf32>
    %cst_9 = arith.constant 9.99999974E-6 : f32
    %12 = vector.broadcast %cst_9 : f32 to vector<1x10xf32>
    %13 = arith.addf %11, %12 : vector<1x10xf32>
    %14 = math.rsqrt %13 : vector<1x10xf32>
    %15 = arith.mulf %2, %14 : vector<1x10xf32>
    %16 = arith.mulf %5, %15 : vector<1x10xf32>
    %17 = arith.subf %3, %16 : vector<1x10xf32>
    %c0_10 = arith.constant 0 : index
    %c0_11 = arith.constant 0 : index
    %18 = vector.load %arg1[%c0_10, %c0_11] : memref<64x10xf32, #tpu.memory_space<vmem>>, vector<64x10xf32>
    %19 = vector.broadcast %15 : vector<1x10xf32> to vector<64x10xf32>
    %20 = arith.mulf %18, %19 : vector<64x10xf32>
    %21 = vector.broadcast %17 : vector<1x10xf32> to vector<64x10xf32>
    %22 = arith.addf %20, %21 : vector<64x10xf32>
    %cst_12 = arith.constant 0.000000e+00 : f32
    %23 = vector.broadcast %cst_12 : f32 to vector<64x10xf32>
    %24 = arith.maximumf %22, %23 : vector<64x10xf32>
    %cst_13 = arith.constant dense<0xFF800000> : vector<64xf32>
    %25 = vector.multi_reduction <maximumf>, %24, %cst_13 [1] : vector<64x10xf32> to vector<64xf32>
    %26 = vector.shape_cast %25 : vector<64xf32> to vector<64x1xf32>
    %27 = vector.broadcast %26 : vector<64x1xf32> to vector<64x10xf32>
    %28 = arith.subf %24, %27 : vector<64x10xf32>
    %29 = math.exp %28 : vector<64x10xf32>
    %cst_14 = arith.constant dense<0.000000e+00> : vector<64xf32>
    %30 = vector.multi_reduction <add>, %29, %cst_14 [1] : vector<64x10xf32> to vector<64xf32>
    %31 = vector.shape_cast %30 : vector<64xf32> to vector<64x1xf32>
    %32 = math.log %31 : vector<64x1xf32>
    %33 = vector.broadcast %32 : vector<64x1xf32> to vector<64x10xf32>
    %34 = arith.subf %28, %33 : vector<64x10xf32>
    %c0_15 = arith.constant 0 : index
    %c0_16 = arith.constant 0 : index
    %35 = vector.load %arg6[%c0_15, %c0_16] : memref<64x10xf32, #tpu.memory_space<vmem>>, vector<64x10xf32>
    tpu.vector_store %arg6[%c0_15, %c0_16], %34 {strides = array<i32>} : memref<64x10xf32, #tpu.memory_space<vmem>>, vector<64x10xf32>,
    return
  }
  func.func @transform_0(%arg0: i32) -> (i32, i32) {
    %c0_i32 = arith.constant 0 : i32
    %c0_i32_0 = arith.constant 0 : i32
    return %arg0, %c0_i32 : i32, i32
  }
  func.func @transform_1(%arg0: i32) -> (i32, i32) {
    %c0_i32 = arith.constant 0 : i32
    %c0_i32_0 = arith.constant 0 : i32
    %c0_i32_1 = arith.constant 0 : i32
    return %c0_i32, %c0_i32_0 : i32, i32
  }
  func.func @transform_2(%arg0: i32) -> (i32, i32) {
    %c0_i32 = arith.constant 0 : i32
    %c0_i32_0 = arith.constant 0 : i32
    %c0_i32_1 = arith.constant 0 : i32
    return %c0_i32, %c0_i32_0 : i32, i32
  }
  func.func @transform_3(%arg0: i32) -> (i32, i32) {
    %c0_i32 = arith.constant 0 : i32
    %c0_i32_0 = arith.constant 0 : i32
    %c0_i32_1 = arith.constant 0 : i32
    return %c0_i32, %c0_i32_0 : i32, i32
  }
  func.func @transform_4(%arg0: i32) -> (i32, i32) {
    %c0_i32 = arith.constant 0 : i32
    %c0_i32_0 = arith.constant 0 : i32
    %c0_i32_1 = arith.constant 0 : i32
    return %c0_i32, %c0_i32_0 : i32, i32
  }
  func.func @transform_5(%arg0: i32) -> (i32, i32) {
    %c0_i32 = arith.constant 0 : i32
    %c0_i32_0 = arith.constant 0 : i32
    return %arg0, %c0_i32 : i32, i32
  }
}

</mosaic_0001>

<bundles_post_ra>
// kernel: first_network_with_normalization.4
= control target key start
LH: loop header
LB: loop body
LE: loop exit
PB: predicated region body
PF: predicated region fallthrough
CT: control target
= control target key end

     0   :  { %s799_s15 = smov 0   ;;  %s898_s0 = inlined_call_operand.vmem [shape: bf16[256,256], index: 0, kind: input, shape index: {}]   ;;  %s899_s1 = inlined_call_operand.vmem [shape: bf16[256,128], index: 1, kind: input, shape index: {}]   ;;  %s900_s2 = inlined_call_operand.vmem [shape: bf16[256,128], index: 2, kind: output, shape index: {0}]   ;;  %s901_s3 = inlined_call_operand.vmem [shape: f32[1,128], index: 3, kind: output, shape index: {1}]   ;;  %s902_s4 = inlined_call_operand.vmem [shape: f32[1,128], index: 4, kind: output, shape index: {2}]  }
   0x1 LB: > { %s595_s16 = sadd.s32 4294967295, %s771_s15   ;;  %p599_p0 = scmp.ge.s32.totalorder %s771_s15, 1  ;;  %s771_s15 = sphi %s799_s15, %s15_s15  }
   0x2   : > { %p159_p1 = scmp.lt.s32.totalorder %s771_s15, 5 }
   0x4   : > { %p160_p2 = pnand %p599_p0, %p159_p1 }
   0x5   : > { %s600_s17 = sshll.u32 (!%p160_p2), %s595_s16, 3  ;;  %p605_p4 = scmp.ne.s32.totalorder (!%p160_p2), %s595_s16, 0 }
   0x6   : > { %163 = sbr.rel (%p160_p2) target bundleno = 287 (0x11f), region = 28  ;;  %p187_p3 = scmp.lt.s32.totalorder (!%p160_p2), %s600_s17, 31 }
   0xb   : > { %s904_s17 = smov (!%p187_p3, %s600_s17), 31  ;;  %203 = sbr.rel (%p605_p4) target bundleno = 18 (0x12), region = 32 }
   0xc   : > { %s640_s18 = sshll.u32 %s904_s17, 3  ;;  %s604_s19 = sshll.u32 %s904_s17, 2 }
   0xd   : > { %s810_s22 = scalar_lea.vmem %s898_s0, %s640_s18  ;;  %s815_s25 = scalar_lea.vmem %s900_s2, %s604_s19 }
  0x10   : > { %v773_v0 = vmov 0.0  }
  0x11   : > { %204 = vst [vmem:[%s901_s3] sm:$0x1] %v773_v0  ;;  %205 = vst [vmem:[%s902_s4] sm:$0x1] %v773_v0 }
  0x12 PF: > { %v737_v1 = vld [vmem:[%s899_s1 + $0x78] sm:$0xff]   ;;  %v739_v3 = vld [vmem:[%s899_s1 + $0x70] sm:$0xff]   ;;  %v741_v5 = vld [vmem:[%s899_s1 + $0x68] sm:$0xff]  }
  0x13   : > { %v738_v2 = vld [vmem:[%s899_s1 + $0x38] sm:$0xff]   ;;  %672 = vmatprep.subr.bf16.mxu0 %v737_v1  ;;  %712 = vmatprep.subr.bf16.mxu1 %v737_v1  ;;  %v740_v4 = vld [vmem:[%s899_s1 + $0x30] sm:$0xff]   ;;  %v742_v6 = vld [vmem:[%s899_s1 + $0x28] sm:$0xff]  }
  0x14   : > { %673 = vmatpush3.bf16.msra.mxu0 %v738_v2  ;;  %720 = vmatpush3.bf16.msra.mxu1 %v738_v2  ;;  %v743_v7 = vld [vmem:[%s899_s1 + $0x60] sm:$0xff]   ;;  %v745_v9 = vld [vmem:[%s899_s1 + $0x58] sm:$0xff]   ;;  %v747_v11 = vld [vmem:[%s899_s1 + $0x50] sm:$0xff]  }
  0x15   : > { %674 = vmatprep.subr.bf16.mxu0 %v739_v3  ;;  %713 = vmatprep.subr.bf16.mxu1 %v739_v3  ;;  %v744_v8 = vld [vmem:[%s899_s1 + $0x20] sm:$0xff]   ;;  %v746_v10 = vld [vmem:[%s899_s1 + $0x18] sm:$0xff]   ;;  %v748_v14 = vld [vmem:[%s899_s1 + $0x10] sm:$0xff]  }
  0x16   : > { %v755_v12 = vld [vmem:[%s810_s22 + $0x4] ss:$8 sps:$4 sm:$0xff]   ;;  %v753_v19 = vld [vmem:[%s810_s22] ss:$8 sps:$4 sm:$0xff]   ;;  %v759_v21 = vld [vmem:[%s810_s22 + $0x14] ss:$8 sps:$4 sm:$0xff]  }
  0x17   : > { %v758_v13 = vld [vmem:[%s810_s22 + $0x24] ss:$8 sps:$4 sm:$0xff]   ;;  %414 = vmatprep.mubr.bf16.mxu0 %v755_v12  ;;  %v756_v20 = vld [vmem:[%s810_s22 + $0x20] ss:$8 sps:$4 sm:$0xff]   ;;  %v762_v22 = vld [vmem:[%s810_s22 + $0x34] ss:$8 sps:$4 sm:$0xff]  }
  0x18   : > { %675 = vmatpush3.bf16.msra.mxu0 %v740_v4  ;;  %721 = vmatpush3.bf16.msra.mxu1 %v740_v4  ;;  %v749_v15 = vld [vmem:[%s899_s1 + $0x48] sm:$0xff]   ;;  %v751_v17 = vld [vmem:[%s899_s1 + $0x40] sm:$0xff]   ;;  %v761_v23 = vld [vmem:[%s810_s22 + $0x10] ss:$8 sps:$4 sm:$0xff]  }
  0x19   : > { %676 = vmatprep.subr.bf16.mxu0 %v741_v5  ;;  %714 = vmatprep.subr.bf16.mxu1 %v741_v5  ;;  %v750_v16 = vld [vmem:[%s899_s1 + $0x8] sm:$0xff]   ;;  %v752_v18 = vld [vmem:[%s899_s1] sm:$0xff]   ;;  %v764_v24 = vld [vmem:[%s810_s22 + $0x30] ss:$8 sps:$4 sm:$0xff]  }
  0x1a   : > { %430 = vmatprep.mubr.bf16.mxu1 %v758_v13 }
  0x1c   : > { %677 = vmatpush3.bf16.msra.mxu0 %v742_v6  ;;  %722 = vmatpush3.bf16.msra.mxu1 %v742_v6 }
  0x1d   : > { %678 = vmatprep.subr.bf16.mxu0 %v743_v7  ;;  %715 = vmatprep.subr.bf16.mxu1 %v743_v7 }
  0x20   : > { %679 = vmatpush3.bf16.msra.mxu0 %v744_v8  ;;  %723 = vmatpush3.bf16.msra.mxu1 %v744_v8 }
  0x21   : > { %680 = vmatprep.subr.bf16.mxu0 %v745_v9  ;;  %716 = vmatprep.subr.bf16.mxu1 %v745_v9 }
  0x24   : > { %681 = vmatpush3.bf16.msra.mxu0 %v746_v10  ;;  %724 = vmatpush3.bf16.msra.mxu1 %v746_v10 }
  0x25   : > { %682 = vmatprep.subr.bf16.mxu0 %v747_v11  ;;  %717 = vmatprep.subr.bf16.mxu1 %v747_v11 }
  0x28   : > { %683 = vmatpush3.bf16.msra.mxu0 %v748_v14  ;;  %725 = vmatpush3.bf16.msra.mxu1 %v748_v14 }
  0x29   : > { %684 = vmatprep.subr.bf16.mxu0 %v749_v15  ;;  %718 = vmatprep.subr.bf16.mxu1 %v749_v15 }
  0x2c   : > { %685 = vmatpush3.bf16.msra.mxu0 %v750_v16  ;;  %726 = vmatpush3.bf16.msra.mxu1 %v750_v16 }
  0x2d   : > { %686 = vmatprep.subr.bf16.mxu0 %v751_v17  ;;  %719 = vmatprep.subr.bf16.mxu1 %v751_v17 }
  0x30   : > { %687 = vmatpush3.bf16.msra.mxu0 %v752_v18  ;;  %727 = vmatpush3.bf16.msra.mxu1 %v752_v18 }
  0x33   : > { %415 = vmatmul.mubr.bf16.vlgmr.msra.gmra.mxu0 %v753_v19  ;;  %431 = vmatmul.mubr.bf16.vlgmr.msra.gmra.mxu1 %v756_v20  ;;  %v487_v20 = vld [vmem:[%s901_s3] sm:$0x1] }
  0x34   : > { %422 = vmatprep.mubr.bf16.mxu0 %v759_v21  ;;  %438 = vmatprep.mubr.bf16.mxu1 %v762_v22 }
  0x3b   : > { %423 = vmatmul.mubr.bf16.gmra.mxu0 %v761_v23  ;;  %439 = vmatmul.mubr.bf16.gmra.mxu1 %v764_v24  ;;  %v503_v23 = vld [vmem:[%s902_s4] sm:$0x1] }
  0xf3   : > { %v688_v25 = vpop.f32.mrf.mxu0  ;;  %v700_v26 = vpop.f32.mrf.mxu1 }
  0xf5   : > { %v689_v27 = vpop.f32.mrf.mxu0  ;;  %v701_v28 = vpop.f32.mrf.mxu1 }
  0xf6   : > { %v702_v31 = vadd.f32 %v701_v28, %v700_v26  ;;  %v690_v34 = vadd.f32 %v689_v27, %v688_v25 }
  0xf7   : > { %v691_v29 = vpop.f32.mrf.mxu0  ;;  %v703_v30 = vpop.f32.mrf.mxu1 }
  0xf8   : > { %v504_v45 = vmul.f32 %v690_v34, %v690_v34  ;;  %v508_v62 = vmul.f32 %v702_v31, %v702_v31 }
  0xf9   : > { %v692_v32 = vpop.f32.mrf.mxu0  ;;  %v704_v33 = vpop.f32.mrf.mxu1 }
  0xfa   : > { %v693_v35 = vadd.f32 %v692_v32, %v691_v29  ;;  %v705_v36 = vadd.f32 %v704_v33, %v703_v30 }
  0xfb   : > { %v694_v37 = vpop.f32.mrf.mxu0  ;;  %v706_v38 = vpop.f32.mrf.mxu1 }
  0xfc   : > { %v652_v39 = vpack.c.bf16 %v693_v35, %v690_v34  ;;  %v662_v40 = vpack.c.bf16 %v705_v36, %v702_v31  ;;  %v505_v41 = vmul.f32 %v693_v35, %v693_v35  ;;  %v488_v48 = vadd.f32 %v693_v35, %v690_v34 }
  0xfd   : > { %v695_v42 = vpop.f32.mrf.mxu0  ;;  %v707_v43 = vpop.f32.mrf.mxu1  ;;  %v509_v1 = vmul.f32 %v705_v36, %v705_v36 }
  0xfe   : > { %653 = vst [vmem:[%s815_s25] sm:$0xff] %v652_v39   ;;  %670 = vst [vmem:[%s815_s25 + $0x10] sm:$0xff] %v662_v40   ;;  %v696_v44 = vadd.f32 %v695_v42, %v694_v37  ;;  %v708_v50 = vadd.f32 %v707_v43, %v706_v38  ;;  %v512_v51 = vadd.f32 %v505_v41, %v504_v45 }
  0xff   : > { %v697_v46 = vpop.f32.mrf.mxu0  ;;  %v709_v47 = vpop.f32.mrf.mxu1 }
 0x100   : > { %v506_v49 = vmul.f32 %v696_v44, %v696_v44  ;;  %v489_v54 = vadd.f32 %v696_v44, %v488_v48  ;;  %v510_v4 = vmul.f32 %v708_v50, %v708_v50 }
 0x101   : > { %v698_v52 = vpop.f32.mrf.mxu0  ;;  %v710_v53 = vpop.f32.mrf.mxu1 }
 0x102   : > { %v699_v55 = vadd.f32 %v698_v52, %v697_v46  ;;  %v711_v56 = vadd.f32 %v710_v53, %v709_v47  ;;  %v513_v57 = vadd.f32 %v512_v51, %v506_v49 }
 0x104   : > { %v657_v58 = vpack.c.bf16 %v699_v55, %v696_v44  ;;  %v490_v59 = vadd.f32 %v699_v55, %v489_v54  ;;  %v507_v60 = vmul.f32 %v699_v55, %v699_v55  ;;  %v667_v61 = vpack.c.bf16 %v711_v56, %v708_v50 }
 0x105   : > { %v511_v8 = vmul.f32 %v711_v56, %v711_v56 }
 0x106   : > { %669 = vst [vmem:[%s815_s25 + $0x8] sm:$0xff] %v657_v58   ;;  %v491_v63 = vadd.f32 %v702_v31, %v490_v59  ;;  %v514_v0 = vadd.f32 %v513_v57, %v507_v60  ;;  %671 = vst [vmem:[%s815_s25 + $0x18] sm:$0xff] %v667_v61  }
 0x108   : > { %v515_v2 = vadd.f32 %v514_v0, %v508_v62  ;;  %v492_v3 = vadd.f32 %v705_v36, %v491_v63 }
 0x10a   : > { %v493_v5 = vadd.f32 %v708_v50, %v492_v3  ;;  %v516_v6 = vadd.f32 %v515_v2, %v509_v1 }
 0x10c   : > { %v494_v7 = vadd.f32 %v711_v56, %v493_v5  ;;  %v517_v9 = vadd.f32 %v516_v6, %v510_v4 }
 0x10e   : > { %v495_v10 = vrot.slane %v494_v7, 4  ;;  %v518_v11 = vadd.f32 %v517_v9, %v511_v8 }
 0x110   : > { %v496_v12 = vadd.f32 %v495_v10, %v494_v7  ;;  %v519_v13 = vrot.slane %v518_v11, 4 }
 0x112   : > { %v497_v14 = vrot.slane %v496_v12, 2  ;;  %v520_v15 = vadd.f32 %v519_v13, %v518_v11 }
 0x114   : > { %v498_v16 = vadd.f32 %v497_v14, %v496_v12  ;;  %v521_v17 = vrot.slane %v520_v15, 2 }
 0x116   : > { %v499_v18 = vrot.slane %v498_v16, 1  ;;  %v522_v19 = vadd.f32 %v521_v17, %v520_v15 }
 0x118   : > { %v500_v21 = vadd.f32 %v499_v18, %v498_v16  ;;  %v523_v22 = vrot.slane %v522_v19, 1 }
 0x11a   : > { %v501_v24 = vadd.f32 %v500_v21, %v487_v20  ;;  %v524_v25 = vadd.f32 %v523_v22, %v522_v19 }
 0x11c   : > { %502 = vst [vmem:[%s901_s3] sm:$0x1] %v501_v24  ;;  %v525_v26 = vadd.f32 %v524_v25, %v503_v23 }
 0x11e   : > { %526 = vst [vmem:[%s902_s4] sm:$0x1] %v525_v26 }
 0x11f PF: > { %s15_s15 = sadd.s32 1, %s771_s15  }
 0x120   : > { %p12_p5 = scmp.ge.s32.totalorder %s15_s15, 6  }
 0x122   :  { %14 = sbr.rel (!%p12_p5) target bundleno = 1 (0x1), region = 78 }

// kernel: first_network_with_normalization.7
= control target key start
LH: loop header
LB: loop body
LE: loop exit
PB: predicated region body
PF: predicated region fallthrough
CT: control target
= control target key end

     0   :  { %s538_s18 = smov 0   ;;  %s640_s0 = inlined_call_operand.vmem [shape: f32[256,10], index: 0, kind: input, shape index: {}]   ;;  %s641_s1 = inlined_call_operand.vmem [shape: f32[1,10], index: 1, kind: input, shape index: {}]   ;;  %s642_s2 = inlined_call_operand.vmem [shape: f32[1,10], index: 2, kind: input, shape index: {}]   ;;  %s643_s3 = inlined_call_operand.vmem [shape: f32[1,10], index: 3, kind: input, shape index: {}]   ;;  %s644_s4 = inlined_call_operand.vmem [shape: f32[1,10], index: 4, kind: input, shape index: {}]   ;;  %s645_s5 = inlined_call_operand.vmem [shape: f32[256,10], index: 5, kind: output, shape index: {}]  }
   0x1 LB: > { %s447_s19 = sadd.s32 4294967295, %s506_s18   ;;  %p451_p0 = scmp.ge.s32.totalorder %s506_s18, 1  ;;  %s506_s18 = sphi %s538_s18, %s15_s18  }
   0x2   : > { %p188_p1 = scmp.lt.s32.totalorder %s506_s18, 5 }
   0x4   : > { %p189_p2 = pnand %p451_p0, %p188_p1 }
   0x5   : > { %s452_s24 = sshll.u32 (!%p189_p2), %s447_s19, 3 }
   0x6   : > { %192 = sbr.rel (%p189_p2) target bundleno = 379 (0x17b), region = 40  ;;  %p217_p3 = scmp.lt.s32.totalorder (!%p189_p2), %s452_s24, 31 }
   0xb   : > { %v228_v0 = vld [vmem:[%s641_s1] sm:$0x1]  ;;  %v251_v8 = vlaneseq  ;;  %s647_s24 = smov (!%p217_p3, %s452_s24), 31  ;;  %vm286_vm0 = vcmask 80896  }
   0xc   : > { %v229_v1 = vld [vmem:[%s642_s2] sm:$0x1]  ;;  %v232_v2 = vmul.f32 0.00390625, %v228_v0  ;;  %s453_s25 = sshll.u32 %s647_s24, 3 }
   0xd   : > { %v233_v3 = vmul.f32 0.00390625, %v229_v1  ;;  %v252_v9 = vshrl.u32 %v251_v8, 7  ;;  %v230_v10 = vld [vmem:[%s643_s3] sm:$0x1]  ;;  %s220_s30 = scalar_lea.vmem %s640_s0, %s453_s25  ;;  %s611_s10 = scalar_lea.vmem %s645_s5, %s453_s25 }
   0xe   : > { %v234_v4 = vmul.f32 %v232_v2, %v232_v2  ;;  %v231_v13 = vld [vmem:[%s644_s4] sm:$0x1]  ;;  %v244_v16 = vld [vmem:[%s220_s30 + $0x10] sm:$0xff]  ;;  %v243_v17 = vld [vmem:[%s220_s30 + $0x8] sm:$0xff] }
   0xf   : > { %v253_v11 = vsub.s32 0, %v252_v9  ;;  %v242_v15 = vld [vmem:[%s220_s30] sm:$0xff]  ;;  %v245_v20 = vld [vmem:[%s220_s30 + $0x18] sm:$0xff]  ;;  %v247_v22 = vld [vmem:[%s220_s30 + $0x28] sm:$0xff] }
  0x10   : > { %v235_v5 = vsub.f32 %v233_v3, %v234_v4  ;;  %v246_v21 = vld [vmem:[%s220_s30 + $0x20] sm:$0xff]  ;;  %v248_v31 = vld [vmem:[%s220_s30 + $0x30] sm:$0xff]  ;;  %v249_v32 = vld [vmem:[%s220_s30 + $0x38] sm:$0xff] }
  0x12   : > { %v236_v6 = vmax.f32 %v235_v5, 0.0 }
  0x14   : > { %v237_v7 = vadd.f32 1e-05, %v236_v6 }
  0x16   : > { %466 = vrsqrt.f32 %v237_v7 }
  0x23   : > { %v467_v12 = vpop.eup %466 }
  0x24   : > { %v239_v14 = vmul.f32 %v467_v12, %v230_v10 }
  0x26   : > { %v240_v18 = vmul.f32 %v239_v14, %v232_v2  ;;  %v254_v19 = vrot.slane %v239_v14, %v253_v11 }
  0x28   : > { %v241_v23 = vsub.f32 %v231_v13, %v240_v18  ;;  %v256_v24 = vmul.f32 %v254_v19, %v242_v15  ;;  %v258_v25 = vmul.f32 %v254_v19, %v244_v16  ;;  %v257_v26 = vmul.f32 %v254_v19, %v243_v17 }
  0x29   : > { %v259_v27 = vmul.f32 %v254_v19, %v245_v20  ;;  %v260_v28 = vmul.f32 %v254_v19, %v246_v21  ;;  %v261_v29 = vmul.f32 %v254_v19, %v247_v22  ;;  %v262_v39 = vmul.f32 %v254_v19, %v248_v31 }
  0x2a   : > { %v268_v30 = vrot.slane %v241_v23, %v253_v11  ;;  %v263_v40 = vmul.f32 %v254_v19, %v249_v32 }
  0x2c   : > { %v270_v33 = vadd.f32 %v268_v30, %v256_v24  ;;  %v272_v34 = vadd.f32 %v268_v30, %v258_v25  ;;  %v271_v35 = vadd.f32 %v268_v30, %v257_v26  ;;  %v273_v36 = vadd.f32 %v268_v30, %v259_v27 }
  0x2d   : > { %v274_v37 = vadd.f32 %v268_v30, %v260_v28  ;;  %v275_v38 = vadd.f32 %v268_v30, %v261_v29  ;;  %v276_v47 = vadd.f32 %v268_v30, %v262_v39  ;;  %v277_v48 = vadd.f32 %v268_v30, %v263_v40 }
  0x2e   : > { %v278_v41 = vmax.f32 %v270_v33, 0.0  ;;  %v280_v42 = vmax.f32 %v272_v34, 0.0  ;;  %v279_v43 = vmax.f32 %v271_v35, 0.0  ;;  %v281_v44 = vmax.f32 %v273_v36, 0.0 }
  0x2f   : > { %v282_v51 = vmax.f32 %v274_v37, 0.0  ;;  %v283_v52 = vmax.f32 %v275_v38, 0.0  ;;  %v284_v55 = vmax.f32 %v276_v47, 0.0  ;;  %v285_v56 = vmax.f32 %v277_v48, 0.0 }
  0x30   : > { %v287_v45 = vsel %vm286_vm0, %v278_v41, -inf  ;;  %v293_v46 = vsel %vm286_vm0, %v280_v42, -inf  ;;  %v290_v49 = vsel %vm286_vm0, %v279_v43, -inf  ;;  %v296_v50 = vsel %vm286_vm0, %v281_v44, -inf }
  0x31   : > { %288 = vmax.xlane.f32.xlu0 %v287_v45  ;;  %294 = vmax.xlane.f32.xlu1 %v293_v46  ;;  %v299_v53 = vsel %vm286_vm0, %v282_v51, -inf  ;;  %v302_v54 = vsel %vm286_vm0, %v283_v52, -inf  ;;  %v305_v57 = vsel %vm286_vm0, %v284_v55, -inf  ;;  %v308_v58 = vsel %vm286_vm0, %v285_v56, -inf }
  0x35   : > { %291 = vmax.xlane.f32.xlu0 %v290_v49  ;;  %297 = vmax.xlane.f32.xlu1 %v296_v50 }
  0x39   : > { %300 = vmax.xlane.f32.xlu0 %v299_v53  ;;  %303 = vmax.xlane.f32.xlu1 %v302_v54 }
  0x3d   : > { %306 = vmax.xlane.f32.xlu0 %v305_v57  ;;  %309 = vmax.xlane.f32.xlu1 %v308_v58 }
  0xba   : > { %v289_v59 = vpop.xlane.xlu0 %288  ;;  %v295_v60 = vpop.xlane.xlu1 %294 }
  0xbb   : > { %v574_v61 = vsub.f32 %v278_v41, %v289_v59  ;;  %v576_v62 = vsub.f32 %v280_v42, %v295_v60 }
  0xbd   : > { %v319_v63 = vmul.f32 1.442695, %v574_v61  ;;  %v323_v0 = vmul.f32 1.442695, %v576_v62 }
  0xbe   : > { %v292_v1 = vpop.xlane.xlu0 %291  ;;  %v298_v2 = vpop.xlane.xlu1 %297 }
  0xbf   : > { %468 = vpow2.f32 %v319_v63  ;;  %v580_v3 = vsub.f32 %v279_v43, %v292_v1  ;;  %v582_v4 = vsub.f32 %v281_v44, %v298_v2 }
  0xc0   : > { %470 = vpow2.f32 %v323_v0 }
  0xc1   : > { %v321_v5 = vmul.f32 1.442695, %v580_v3  ;;  %v325_v6 = vmul.f32 1.442695, %v582_v4 }
  0xc2   : > { %v301_v7 = vpop.xlane.xlu0 %300  ;;  %v304_v8 = vpop.xlane.xlu1 %303 }
  0xc3   : > { %472 = vpow2.f32 %v321_v5  ;;  %v586_v9 = vsub.f32 %v282_v51, %v301_v7  ;;  %v588_v10 = vsub.f32 %v283_v52, %v304_v8 }
  0xc4   : > { %474 = vpow2.f32 %v325_v6 }
  0xc5   : > { %v327_v11 = vmul.f32 1.442695, %v586_v9  ;;  %v329_v12 = vmul.f32 1.442695, %v588_v10 }
  0xc6   : > { %v307_v13 = vpop.xlane.xlu0 %306  ;;  %v310_v14 = vpop.xlane.xlu1 %309 }
  0xc7   : > { %476 = vpow2.f32 %v327_v11  ;;  %v592_v15 = vsub.f32 %v284_v55, %v307_v13  ;;  %v594_v16 = vsub.f32 %v285_v56, %v310_v14 }
  0xc8   : > { %478 = vpow2.f32 %v329_v12 }
  0xc9   : > { %v331_v17 = vmul.f32 1.442695, %v592_v15  ;;  %v333_v18 = vmul.f32 1.442695, %v594_v16 }
  0xcb   : > { %480 = vpow2.f32 %v331_v17 }
  0xcc   : > { %v469_v19 = vpop.eup %468  ;;  %482 = vpow2.f32 %v333_v18 }
  0xcd   : > { %v471_v20 = vpop.eup %470  ;;  %v335_v21 = vsel %vm286_vm0, %v469_v19, 0.0 }
  0xce   : > { %336 = vadd.xlane.f32.xlu0 %v335_v21  ;;  %v341_v22 = vsel %vm286_vm0, %v471_v20, 0.0 }
  0xd0   : > { %v473_v23 = vpop.eup %472 }
  0xd1   : > { %v475_v24 = vpop.eup %474  ;;  %v338_v25 = vsel %vm286_vm0, %v473_v23, 0.0 }
  0xd2   : > { %342 = vadd.xlane.f32.xlu0 %v341_v22  ;;  %339 = vadd.xlane.f32.xlu1 %v338_v25  ;;  %v344_v26 = vsel %vm286_vm0, %v475_v24, 0.0 }
  0xd4   : > { %v477_v27 = vpop.eup %476 }
  0xd5   : > { %v479_v28 = vpop.eup %478  ;;  %v347_v29 = vsel %vm286_vm0, %v477_v27, 0.0 }
  0xd6   : > { %345 = vadd.xlane.f32.xlu1 %v344_v26  ;;  %348 = vadd.xlane.f32.xlu0 %v347_v29  ;;  %v350_v30 = vsel %vm286_vm0, %v479_v28, 0.0 }
  0xd8   : > { %v481_v31 = vpop.eup %480 }
  0xd9   : > { %v483_v32 = vpop.eup %482  ;;  %v353_v33 = vsel %vm286_vm0, %v481_v31, 0.0 }
  0xda   : > { %351 = vadd.xlane.f32.xlu1 %v350_v30  ;;  %354 = vadd.xlane.f32.xlu0 %v353_v33  ;;  %v356_v34 = vsel %vm286_vm0, %v483_v32, 0.0 }
  0xde   : > { %357 = vadd.xlane.f32.xlu1 %v356_v34 }
 0x157   : > { %v337_v35 = vpop.xlane.xlu0 %336 }
 0x158   : > { %484 = vlog2.f32 %v337_v35 }
 0x15b   : > { %v340_v36 = vpop.xlane.xlu1 %339  ;;  %v343_v37 = vpop.xlane.xlu0 %342 }
 0x15c   : > { %486 = vlog2.f32 %v340_v36 }
 0x15d   : > { %488 = vlog2.f32 %v343_v37 }
 0x15f   : > { %v346_v38 = vpop.xlane.xlu1 %345  ;;  %v349_v39 = vpop.xlane.xlu0 %348 }
 0x160   : > { %490 = vlog2.f32 %v346_v38 }
 0x161   : > { %492 = vlog2.f32 %v349_v39 }
 0x163   : > { %v352_v40 = vpop.xlane.xlu1 %351  ;;  %v355_v41 = vpop.xlane.xlu0 %354 }
 0x164   : > { %494 = vlog2.f32 %v352_v40 }
 0x165   : > { %v485_v42 = vpop.eup %484  ;;  %496 = vlog2.f32 %v355_v41 }
 0x166   : > { %v360_v43 = vmul.f32 0.6931472, %v485_v42 }
 0x167   : > { %v358_v44 = vpop.xlane.xlu1 %357 }
 0x168   : > { %v375_v45 = vsub.f32 %v574_v61, %v360_v43  ;;  %498 = vlog2.f32 %v358_v44 }
 0x169   : > { %v487_v46 = vpop.eup %486 }
 0x16a   : > { %v489_v47 = vpop.eup %488  ;;  %383 = vst.msk [vmem:[%s611_s10] sm:$0xff] %vm286_vm0, %v375_v45  ;;  %v362_v48 = vmul.f32 0.6931472, %v487_v46 }
 0x16b   : > { %v364_v49 = vmul.f32 0.6931472, %v489_v47 }
 0x16c   : > { %v376_v50 = vsub.f32 %v580_v3, %v362_v48 }
 0x16d   : > { %v491_v51 = vpop.eup %490  ;;  %v377_v52 = vsub.f32 %v576_v62, %v364_v49 }
 0x16e   : > { %v493_v53 = vpop.eup %492  ;;  %384 = vst.msk [vmem:[%s611_s10 + $0x8] sm:$0xff] %vm286_vm0, %v376_v50  ;;  %v366_v54 = vmul.f32 0.6931472, %v491_v51 }
 0x16f   : > { %385 = vst.msk [vmem:[%s611_s10 + $0x10] sm:$0xff] %vm286_vm0, %v377_v52  ;;  %v368_v55 = vmul.f32 0.6931472, %v493_v53 }
 0x170   : > { %v378_v56 = vsub.f32 %v582_v4, %v366_v54 }
 0x171   : > { %v495_v57 = vpop.eup %494  ;;  %v379_v58 = vsub.f32 %v586_v9, %v368_v55 }
 0x172   : > { %v497_v59 = vpop.eup %496  ;;  %386 = vst.msk [vmem:[%s611_s10 + $0x18] sm:$0xff] %vm286_vm0, %v378_v56  ;;  %v370_v60 = vmul.f32 0.6931472, %v495_v57 }
 0x173   : > { %387 = vst.msk [vmem:[%s611_s10 + $0x20] sm:$0xff] %vm286_vm0, %v379_v58  ;;  %v372_v61 = vmul.f32 0.6931472, %v497_v59 }
 0x174   : > { %v380_v62 = vsub.f32 %v588_v10, %v370_v60 }
 0x175   : > { %v499_v63 = vpop.eup %498  ;;  %v381_v0 = vsub.f32 %v592_v15, %v372_v61 }
 0x176   : > { %388 = vst.msk [vmem:[%s611_s10 + $0x28] sm:$0xff] %vm286_vm0, %v380_v62  ;;  %v374_v1 = vmul.f32 0.6931472, %v499_v63 }
 0x177   : > { %389 = vst.msk [vmem:[%s611_s10 + $0x30] sm:$0xff] %vm286_vm0, %v381_v0 }
 0x178   : > { %v382_v2 = vsub.f32 %v594_v16, %v374_v1 }
 0x17a   : > { %390 = vst.msk [vmem:[%s611_s10 + $0x38] sm:$0xff] %vm286_vm0, %v382_v2 }
 0x17b PF: > { %s15_s18 = sadd.s32 1, %s506_s18  }
 0x17c   : > { %p12_p4 = scmp.ge.s32.totalorder %s15_s18, 6  }
 0x17e   :  { %14 = sbr.rel (!%p12_p4) target bundleno = 1 (0x1), region = 70 }

// kernel: first_network_with_normalization.6
= control target key start
LH: loop header
LB: loop body
LE: loop exit
PB: predicated region body
PF: predicated region fallthrough
CT: control target
= control target key end

     0   :  { %s766_s27 = smov 0   ;;  %s869_s0 = inlined_call_operand.vmem [shape: bf16[256,64], index: 0, kind: input, shape index: {}]   ;;  %s870_s1 = inlined_call_operand.vmem [shape: f32[1,64], index: 1, kind: input, shape index: {}]   ;;  %s871_s2 = inlined_call_operand.vmem [shape: f32[1,64], index: 2, kind: input, shape index: {}]   ;;  %s872_s3 = inlined_call_operand.vmem [shape: f32[1,64], index: 3, kind: input, shape index: {}]   ;;  %s873_s4 = inlined_call_operand.vmem [shape: f32[1,64], index: 4, kind: input, shape index: {}]   ;;  %s874_s5 = inlined_call_operand.vmem [shape: bf16[64,10], index: 5, kind: input, shape index: {}]   ;;  %s875_s6 = inlined_call_operand.vmem [shape: f32[256,10], index: 6, kind: output, shape index: {0}]   ;;  %s876_s7 = inlined_call_operand.vmem [shape: f32[1,10], index: 7, kind: output, shape index: {1}]   ;;  %s877_s8 = inlined_call_operand.vmem [shape: f32[1,10], index: 8, kind: output, shape index: {2}]  }
   0x1 LB: > { %s626_s28 = sadd.s32 4294967295, %s718_s27   ;;  %p630_p0 = scmp.ge.s32.totalorder %s718_s27, 1  ;;  %s718_s27 = sphi %s766_s27, %s19_s27  }
   0x2   : > { %p258_p1 = scmp.lt.s32.totalorder %s718_s27, 5 }
   0x4   : > { %p259_p2 = pnand %p630_p0, %p258_p1 }
   0x5   : > { %s631_s29 = sshll.u32 (!%p259_p2), %s626_s28, 3  ;;  %p635_p4 = scmp.ne.s32.totalorder (!%p259_p2), %s626_s28, 0 }
   0x6   : > { %262 = sbr.rel (%p259_p2) target bundleno = 290 (0x122), region = 44  ;;  %p293_p3 = scmp.lt.s32.totalorder (!%p259_p2), %s631_s29, 31 }
   0xb   : > { %s879_s29 = smov (!%p293_p3, %s631_s29), 31  ;;  %308 = sbr.rel (%p635_p4) target bundleno = 18 (0x12), region = 48 }
   0xc   : > { %s632_s30 = sshll.u32 %s879_s29, 2  ;;  %s634_s9 = sshll.u32 %s879_s29, 3 }
   0xd   : > { %s777_s12 = scalar_lea.vmem %s869_s0, %s632_s30  ;;  %s782_s15 = scalar_lea.vmem %s875_s6, %s634_s9 }
  0x10   : > { %vm309_vm0 = vcmask 73728   ;;  %v720_v0 = vmov 0.0  }
  0x11   : > { %310 = vst.msk [vmem:[%s876_s7] sm:$0x1] %vm309_vm0, %v720_v0  ;;  %311 = vst.msk [vmem:[%s877_s8] sm:$0x1] %vm309_vm0, %v720_v0 }
  0x12 PF: > { %v706_v1 = vld [vmem:[%s874_s5 + $0x18] sm:$0xff]   ;;  %v707_v2 = vld [vmem:[%s874_s5 + $0x10] sm:$0xff]   ;;  %v708_v3 = vld [vmem:[%s874_s5 + $0x8] sm:$0xff]   ;;  %v343_v13 = vlaneseq  ;;  %vm414_vm1 = vcmask 523264   ;;  %vm492_vm2 = vcmask 80896   ;;  %vm524_vm3 = vcmask 73728  }
  0x13   : > { %673 = vmatprep.subr.bf16.mxu0 %v706_v1  ;;  %689 = vmatprep.subr.bf16.mxu1 %v706_v1  ;;  %v312_v4 = vld [vmem:[%s870_s1] sm:$0x1]  ;;  %v662_v17 = vld [vmem:[%s777_s12 + $0x8] sm:$0xff]   ;;  %v663_v19 = vld [vmem:[%s777_s12 + $0x10] sm:$0xff]  }
  0x14   : > { %674 = vmatpush3.bf16.msra.mxu0 %v706_v1  ;;  %693 = vmatpush3.bf16.msra.mxu1 %v706_v1  ;;  %v313_v5 = vld [vmem:[%s871_s2] sm:$0x1]  ;;  %v316_v6 = vmul.f32 0.00390625, %v312_v4  ;;  %v344_v14 = vshrl.u32 %v343_v13, 7  ;;  %v664_v20 = vld [vmem:[%s777_s12 + $0x18] sm:$0xff]   ;;  %v652_v25 = vunpack.c.l.bf16 %v662_v17  ;;  %v653_v27 = vunpack.c.h.bf16 %v662_v17 }
  0x15   : > { %675 = vmatprep.subr.bf16.mxu0 %v707_v2  ;;  %690 = vmatprep.subr.bf16.mxu1 %v707_v2  ;;  %v317_v7 = vmul.f32 0.00390625, %v313_v5  ;;  %v709_v9 = vld [vmem:[%s874_s5] sm:$0xff]   ;;  %v656_v28 = vunpack.c.l.bf16 %v663_v19  ;;  %v657_v29 = vunpack.c.h.bf16 %v663_v19  ;;  %v660_v30 = vunpack.c.l.bf16 %v664_v20 }
  0x16   : > { %v318_v8 = vmul.f32 %v316_v6, %v316_v6  ;;  %v314_v15 = vld [vmem:[%s872_s3] sm:$0x1]  ;;  %v345_v18 = vsub.s32 0, %v344_v14  ;;  %v661_v33 = vunpack.c.h.bf16 %v664_v20 }
  0x17   : > { %v647_v16 = vld [vmem:[%s777_s12] sm:$0xff]  }
  0x18   : > { %676 = vmatpush3.bf16.msra.mxu0 %v707_v2  ;;  %694 = vmatpush3.bf16.msra.mxu1 %v707_v2  ;;  %v319_v10 = vsub.f32 %v317_v7, %v318_v8  ;;  %v648_v23 = vunpack.c.l.bf16 %v647_v16  ;;  %v649_v24 = vunpack.c.h.bf16 %v647_v16  ;;  %v315_v26 = vld [vmem:[%s873_s4] sm:$0x1] }
  0x19   : > { %677 = vmatprep.subr.bf16.mxu0 %v708_v3  ;;  %691 = vmatprep.subr.bf16.mxu1 %v708_v3 }
  0x1a   : > { %v320_v11 = vmax.f32 %v319_v10, 0.0 }
  0x1c   : > { %678 = vmatpush3.bf16.msra.mxu0 %v708_v3  ;;  %695 = vmatpush3.bf16.msra.mxu1 %v708_v3  ;;  %v321_v12 = vadd.f32 1e-05, %v320_v11 }
  0x1d   : > { %679 = vmatprep.subr.bf16.mxu0 %v709_v9  ;;  %692 = vmatprep.subr.bf16.mxu1 %v709_v9 }
  0x1e   : > { %710 = vrsqrt.f32 %v321_v12 }
  0x20   : > { %680 = vmatpush3.bf16.msra.mxu0 %v709_v9  ;;  %696 = vmatpush3.bf16.msra.mxu1 %v709_v9 }
  0x2b   : > { %v711_v21 = vpop.eup %710 }
  0x2c   : > { %v323_v22 = vmul.f32 %v711_v21, %v314_v15 }
  0x2e   : > { %v324_v31 = vmul.f32 %v323_v22, %v316_v6  ;;  %v346_v32 = vrot.slane %v323_v22, %v345_v18 }
  0x30   : > { %v325_v34 = vsub.f32 %v315_v26, %v324_v31  ;;  %v348_v35 = vmul.f32 %v648_v23, %v346_v32  ;;  %v349_v36 = vmul.f32 %v649_v24, %v346_v32  ;;  %v350_v37 = vmul.f32 %v652_v25, %v346_v32 }
  0x31   : > { %v351_v38 = vmul.f32 %v653_v27, %v346_v32  ;;  %v352_v39 = vmul.f32 %v656_v28, %v346_v32  ;;  %v353_v40 = vmul.f32 %v657_v29, %v346_v32  ;;  %v354_v41 = vmul.f32 %v660_v30, %v346_v32 }
  0x32   : > { %v360_v42 = vrot.slane %v325_v34, %v345_v18  ;;  %v355_v43 = vmul.f32 %v661_v33, %v346_v32 }
  0x34   : > { %v362_v44 = vadd.f32 %v360_v42, %v348_v35  ;;  %v363_v45 = vadd.f32 %v360_v42, %v349_v36  ;;  %v364_v46 = vadd.f32 %v360_v42, %v350_v37  ;;  %v365_v47 = vadd.f32 %v360_v42, %v351_v38 }
  0x35   : > { %v366_v48 = vadd.f32 %v360_v42, %v352_v39  ;;  %v367_v49 = vadd.f32 %v360_v42, %v353_v40  ;;  %v368_v50 = vadd.f32 %v360_v42, %v354_v41  ;;  %v369_v51 = vadd.f32 %v360_v42, %v355_v43 }
  0x36   : > { %v370_v52 = vmax.f32 %v362_v44, 0.0  ;;  %v371_v53 = vmax.f32 %v363_v45, 0.0  ;;  %v372_v54 = vmax.f32 %v364_v46, 0.0  ;;  %v373_v55 = vmax.f32 %v365_v47, 0.0 }
  0x37   : > { %v374_v56 = vmax.f32 %v366_v48, 0.0  ;;  %v375_v57 = vmax.f32 %v367_v49, 0.0  ;;  %v376_v58 = vmax.f32 %v368_v50, 0.0  ;;  %v377_v59 = vmax.f32 %v369_v51, 0.0 }
  0x38   : > { %v378_v60 = vpack.c.bf16 %v371_v53, %v370_v52  ;;  %v379_v61 = vpack.c.bf16 %v373_v55, %v372_v54  ;;  %v501_v55 = vld [vmem:[%s876_s7] sm:$0x1] }
  0x39   : > { %v380_v62 = vpack.c.bf16 %v375_v57, %v374_v56  ;;  %v381_v63 = vpack.c.bf16 %v377_v59, %v376_v58  ;;  %v526_v58 = vld [vmem:[%s877_s8] sm:$0x1] }
  0x3a   : > { %681 = vmatprep.mubr.msk.bf16.mxu0 %vm414_vm1, %v378_v60 }
  0x3b   : > { %682 = vmatmul.mubr.msk.bf16.vlgmr.msra.gmra.mxu0 %vm414_vm1, %v379_v61  ;;  %685 = vmatprep.mubr.msk.bf16.mxu1 %vm414_vm1, %v380_v62 }
  0x3c   : > { %686 = vmatmul.mubr.msk.bf16.vlgmr.msra.gmra.mxu1 %vm414_vm1, %v381_v63 }
  0xfb   : > { %v683_v0 = vpop.f32.mrf.mxu0 }
  0xfc   : > { %495 = vst.msk [vmem:[%s782_s15 + $0x10] sm:$0xff] %vm492_vm2, %v683_v0  ;;  %v687_v1 = vpop.f32.mrf.mxu1  ;;  %v529_v8 = vmul.f32 %v683_v0, %v683_v0  ;;  %v505_v14 = vsel %vm492_vm2, %v683_v0, 0.0 }
  0xfd   : > { %v461_v2 = vpop.f32.mrf.mxu0  ;;  %499 = vst.msk [vmem:[%s782_s15 + $0x30] sm:$0xff] %vm492_vm2, %v687_v1  ;;  %v533_v30 = vmul.f32 %v687_v1, %v687_v1  ;;  %v513_v35 = vsel %vm492_vm2, %v687_v1, 0.0 }
  0xfe   : > { %493 = vst.msk [vmem:[%s782_s15] sm:$0xff] %vm492_vm2, %v461_v2  ;;  %v477_v3 = vpop.f32.mrf.mxu1  ;;  %v527_v5 = vmul.f32 %v461_v2, %v461_v2  ;;  %v502_v9 = vsel %vm492_vm2, %v461_v2, 0.0  ;;  %v538_v20 = vsel %vm492_vm2, %v529_v8, 0.0 }
  0xff   : > { %v684_v4 = vpop.f32.mrf.mxu0  ;;  %497 = vst.msk [vmem:[%s782_s15 + $0x20] sm:$0xff] %vm492_vm2, %v477_v3  ;;  %v531_v22 = vmul.f32 %v477_v3, %v477_v3  ;;  %v509_v26 = vsel %vm492_vm2, %v477_v3, 0.0  ;;  %v546_v40 = vsel %vm492_vm2, %v533_v30, 0.0 }
 0x100   : > { %496 = vst.msk [vmem:[%s782_s15 + $0x18] sm:$0xff] %vm492_vm2, %v684_v4  ;;  %v688_v6 = vpop.f32.mrf.mxu1  ;;  %v535_v15 = vsel %vm492_vm2, %v527_v5, 0.0  ;;  %v530_v16 = vmul.f32 %v684_v4, %v684_v4  ;;  %v507_v21 = vsel %vm492_vm2, %v684_v4, 0.0 }
 0x101   : > { %v464_v7 = vpop.f32.mrf.mxu0  ;;  %500 = vst.msk [vmem:[%s782_s15 + $0x38] sm:$0xff] %vm492_vm2, %v688_v6  ;;  %v542_v31 = vsel %vm492_vm2, %v531_v22, 0.0  ;;  %v534_v36 = vmul.f32 %v688_v6, %v688_v6  ;;  %v515_v41 = vsel %vm492_vm2, %v688_v6, 0.0 }
 0x102   : > { %494 = vst.msk [vmem:[%s782_s15 + $0x8] sm:$0xff] %vm492_vm2, %v464_v7  ;;  %v503_v10 = vsel %vm492_vm2, %v464_v7, 0.0  ;;  %v528_v11 = vmul.f32 %v464_v7, %v464_v7  ;;  %v480_v12 = vpop.f32.mrf.mxu1  ;;  %v540_v25 = vsel %vm492_vm2, %v530_v16, 0.0 }
 0x103   : > { %v504_v13 = vadd.f32 %v503_v10, %v502_v9  ;;  %498 = vst.msk [vmem:[%s782_s15 + $0x28] sm:$0xff] %vm492_vm2, %v480_v12  ;;  %v532_v27 = vmul.f32 %v480_v12, %v480_v12  ;;  %v511_v32 = vsel %vm492_vm2, %v480_v12, 0.0  ;;  %v548_v44 = vsel %vm492_vm2, %v534_v36, 0.0 }
 0x104   : > { %v536_v17 = vsel %vm492_vm2, %v528_v11, 0.0 }
 0x105   : > { %v506_v18 = vadd.f32 %v505_v14, %v504_v13  ;;  %v537_v19 = vadd.f32 %v536_v17, %v535_v15  ;;  %v544_v37 = vsel %vm492_vm2, %v532_v27, 0.0 }
 0x107   : > { %v539_v23 = vadd.f32 %v538_v20, %v537_v19  ;;  %v508_v24 = vadd.f32 %v507_v21, %v506_v18 }
 0x109   : > { %v510_v28 = vadd.f32 %v509_v26, %v508_v24  ;;  %v541_v29 = vadd.f32 %v540_v25, %v539_v23 }
 0x10b   : > { %v512_v33 = vadd.f32 %v511_v32, %v510_v28  ;;  %v543_v34 = vadd.f32 %v542_v31, %v541_v29 }
 0x10d   : > { %v514_v38 = vadd.f32 %v513_v35, %v512_v33  ;;  %v545_v39 = vadd.f32 %v544_v37, %v543_v34 }
 0x10f   : > { %v516_v42 = vadd.f32 %v515_v41, %v514_v38  ;;  %v547_v43 = vadd.f32 %v546_v40, %v545_v39 }
 0x111   : > { %v517_v45 = vrot.slane %v516_v42, 4  ;;  %v549_v46 = vadd.f32 %v548_v44, %v547_v43 }
 0x113   : > { %v518_v47 = vadd.f32 %v517_v45, %v516_v42  ;;  %v550_v48 = vrot.slane %v549_v46, 4 }
 0x115   : > { %v519_v49 = vrot.slane %v518_v47, 2  ;;  %v551_v50 = vadd.f32 %v550_v48, %v549_v46 }
 0x117   : > { %v520_v51 = vadd.f32 %v519_v49, %v518_v47  ;;  %v552_v52 = vrot.slane %v551_v50, 2 }
 0x119   : > { %v521_v53 = vrot.slane %v520_v51, 1  ;;  %v553_v54 = vadd.f32 %v552_v52, %v551_v50 }
 0x11b   : > { %v522_v56 = vadd.f32 %v521_v53, %v520_v51  ;;  %v554_v57 = vrot.slane %v553_v54, 1 }
 0x11d   : > { %v523_v59 = vadd.f32 %v522_v56, %v501_v55  ;;  %v555_v60 = vadd.f32 %v554_v57, %v553_v54 }
 0x11f   : > { %525 = vst.msk [vmem:[%s876_s7] sm:$0x1] %vm524_vm3, %v523_v59  ;;  %v556_v61 = vadd.f32 %v555_v60, %v526_v58 }
 0x121   : > { %557 = vst.msk [vmem:[%s877_s8] sm:$0x1] %vm524_vm3, %v556_v61 }
 0x122 PF: > { %s19_s27 = sadd.s32 1, %s718_s27  }
 0x123   : > { %p16_p5 = scmp.ge.s32.totalorder %s19_s27, 6  }
 0x125   :  { %18 = sbr.rel (!%p16_p5) target bundleno = 1 (0x1), region = 94 }

// kernel: first_network_with_normalization.5
= control target key start
LH: loop header
LB: loop body
LE: loop exit
PB: predicated region body
PF: predicated region fallthrough
CT: control target
= control target key end

     0   :  { %s858_s27 = smov 0   ;;  %s969_s0 = inlined_call_operand.vmem [shape: bf16[256,128], index: 0, kind: input, shape index: {}]   ;;  %s970_s1 = inlined_call_operand.vmem [shape: f32[1,128], index: 1, kind: input, shape index: {}]   ;;  %s971_s2 = inlined_call_operand.vmem [shape: f32[1,128], index: 2, kind: input, shape index: {}]   ;;  %s972_s3 = inlined_call_operand.vmem [shape: f32[1,128], index: 3, kind: input, shape index: {}]   ;;  %s973_s4 = inlined_call_operand.vmem [shape: f32[1,128], index: 4, kind: input, shape index: {}]   ;;  %s974_s5 = inlined_call_operand.vmem [shape: bf16[128,64], index: 5, kind: input, shape index: {}]   ;;  %s975_s6 = inlined_call_operand.vmem [shape: bf16[256,64], index: 6, kind: output, shape index: {0}]   ;;  %s976_s7 = inlined_call_operand.vmem [shape: f32[1,64], index: 7, kind: output, shape index: {1}]   ;;  %s977_s8 = inlined_call_operand.vmem [shape: f32[1,64], index: 8, kind: output, shape index: {2}]  }
   0x1 LB: > { %s678_s28 = sadd.s32 4294967295, %s810_s27   ;;  %p682_p0 = scmp.ge.s32.totalorder %s810_s27, 1  ;;  %s810_s27 = sphi %s858_s27, %s19_s27  }
   0x2   : > { %p258_p1 = scmp.lt.s32.totalorder %s810_s27, 5 }
   0x4   : > { %p259_p2 = pnand %p682_p0, %p258_p1 }
   0x5   : > { %s683_s29 = sshll.u32 (!%p259_p2), %s678_s28, 3  ;;  %p687_p4 = scmp.ne.s32.totalorder (!%p259_p2), %s678_s28, 0 }
   0x6   : > { %262 = sbr.rel (%p259_p2) target bundleno = 291 (0x123), region = 44  ;;  %p293_p3 = scmp.lt.s32.totalorder (!%p259_p2), %s683_s29, 31 }
   0xb   : > { %s979_s29 = smov (!%p293_p3, %s683_s29), 31  ;;  %308 = sbr.rel (%p687_p4) target bundleno = 18 (0x12), region = 48 }
   0xc   : > { %s684_s30 = sshll.u32 %s979_s29, 2 }
   0xd   : > { %s869_s11 = scalar_lea.vmem %s969_s0, %s684_s30  ;;  %s874_s14 = scalar_lea.vmem %s975_s6, %s684_s30 }
  0x10   : > { %vm309_vm0 = vcmask 516096   ;;  %v812_v0 = vmov 0.0  }
  0x11   : > { %310 = vst.msk [vmem:[%s976_s7] sm:$0x1] %vm309_vm0, %v812_v0  ;;  %311 = vst.msk [vmem:[%s977_s8] sm:$0x1] %vm309_vm0, %v812_v0 }
  0x12 PF: > { %v794_v1 = vld [vmem:[%s974_s5 + $0x38] sm:$0xff]   ;;  %v795_v2 = vld [vmem:[%s974_s5 + $0x30] sm:$0xff]   ;;  %v796_v3 = vld [vmem:[%s974_s5 + $0x28] sm:$0xff]   ;;  %v343_v16 = vlaneseq  ;;  %vm543_vm1 = vcmask 519168   ;;  %vm553_vm2 = vcmask 523264   ;;  %vm576_vm3 = vcmask 516096  }
  0x13   : > { %745 = vmatprep.subr.bf16.mxu0 %v794_v1  ;;  %769 = vmatprep.subr.bf16.mxu1 %v794_v1  ;;  %v797_v4 = vld [vmem:[%s974_s5 + $0x20] sm:$0xff]   ;;  %v798_v10 = vld [vmem:[%s974_s5 + $0x18] sm:$0xff]   ;;  %v799_v13 = vld [vmem:[%s974_s5 + $0x10] sm:$0xff]  }
  0x14   : > { %746 = vmatpush3.bf16.msra.mxu0 %v794_v1  ;;  %777 = vmatpush3.bf16.msra.mxu1 %v794_v1  ;;  %v312_v5 = vld [vmem:[%s970_s1] sm:$0x1]  ;;  %v800_v15 = vld [vmem:[%s974_s5 + $0x8] sm:$0xff]   ;;  %v344_v18 = vshrl.u32 %v343_v16, 7  ;;  %v731_v23 = vld [vmem:[%s869_s11 + $0x10] sm:$0xff]  }
  0x15   : > { %747 = vmatprep.subr.bf16.mxu0 %v795_v2  ;;  %770 = vmatprep.subr.bf16.mxu1 %v795_v2  ;;  %v313_v6 = vld [vmem:[%s971_s2] sm:$0x1]  ;;  %v316_v7 = vmul.f32 0.00390625, %v312_v5  ;;  %v730_v21 = vld [vmem:[%s869_s11 + $0x8] sm:$0xff]   ;;  %v732_v24 = vld [vmem:[%s869_s11 + $0x18] sm:$0xff]   ;;  %v724_v32 = vunpack.c.l.bf16 %v731_v23  ;;  %v725_v33 = vunpack.c.h.bf16 %v731_v23 }
  0x16   : > { %v317_v8 = vmul.f32 0.00390625, %v313_v6  ;;  %v801_v17 = vld [vmem:[%s974_s5] sm:$0xff]   ;;  %v345_v22 = vsub.s32 0, %v344_v18  ;;  %v720_v29 = vunpack.c.l.bf16 %v730_v21  ;;  %v721_v31 = vunpack.c.h.bf16 %v730_v21 }
  0x17   : > { %v318_v9 = vmul.f32 %v316_v7, %v316_v7  ;;  %v314_v19 = vld [vmem:[%s972_s3] sm:$0x1]  ;;  %v728_v34 = vunpack.c.l.bf16 %v732_v24  ;;  %v729_v37 = vunpack.c.h.bf16 %v732_v24 }
  0x18   : > { %748 = vmatpush3.bf16.msra.mxu0 %v795_v2  ;;  %778 = vmatpush3.bf16.msra.mxu1 %v795_v2  ;;  %v715_v20 = vld [vmem:[%s869_s11] sm:$0xff]  }
  0x19   : > { %749 = vmatprep.subr.bf16.mxu0 %v796_v3  ;;  %771 = vmatprep.subr.bf16.mxu1 %v796_v3  ;;  %v319_v11 = vsub.f32 %v317_v8, %v318_v9  ;;  %v716_v27 = vunpack.c.l.bf16 %v715_v20  ;;  %v717_v28 = vunpack.c.h.bf16 %v715_v20  ;;  %v315_v30 = vld [vmem:[%s973_s4] sm:$0x1] }
  0x1b   : > { %v320_v12 = vmax.f32 %v319_v11, 0.0 }
  0x1c   : > { %750 = vmatpush3.bf16.msra.mxu0 %v796_v3  ;;  %779 = vmatpush3.bf16.msra.mxu1 %v796_v3 }
  0x1d   : > { %751 = vmatprep.subr.bf16.mxu0 %v797_v4  ;;  %772 = vmatprep.subr.bf16.mxu1 %v797_v4  ;;  %v321_v14 = vadd.f32 1e-05, %v320_v12 }
  0x1f   : > { %802 = vrsqrt.f32 %v321_v14 }
  0x20   : > { %752 = vmatpush3.bf16.msra.mxu0 %v797_v4  ;;  %780 = vmatpush3.bf16.msra.mxu1 %v797_v4 }
  0x21   : > { %753 = vmatprep.subr.bf16.mxu0 %v798_v10  ;;  %773 = vmatprep.subr.bf16.mxu1 %v798_v10 }
  0x24   : > { %754 = vmatpush3.bf16.msra.mxu0 %v798_v10  ;;  %781 = vmatpush3.bf16.msra.mxu1 %v798_v10 }
  0x25   : > { %755 = vmatprep.subr.bf16.mxu0 %v799_v13  ;;  %774 = vmatprep.subr.bf16.mxu1 %v799_v13 }
  0x28   : > { %756 = vmatpush3.bf16.msra.mxu0 %v799_v13  ;;  %782 = vmatpush3.bf16.msra.mxu1 %v799_v13 }
  0x29   : > { %757 = vmatprep.subr.bf16.mxu0 %v800_v15  ;;  %775 = vmatprep.subr.bf16.mxu1 %v800_v15 }
  0x2c   : > { %758 = vmatpush3.bf16.msra.mxu0 %v800_v15  ;;  %783 = vmatpush3.bf16.msra.mxu1 %v800_v15  ;;  %v803_v25 = vpop.eup %802 }
  0x2d   : > { %759 = vmatprep.subr.bf16.mxu0 %v801_v17  ;;  %776 = vmatprep.subr.bf16.mxu1 %v801_v17  ;;  %v323_v26 = vmul.f32 %v803_v25, %v314_v19 }
  0x2f   : > { %v324_v35 = vmul.f32 %v323_v26, %v316_v7  ;;  %v346_v36 = vrot.slane %v323_v26, %v345_v22 }
  0x30   : > { %760 = vmatpush3.bf16.msra.mxu0 %v801_v17  ;;  %784 = vmatpush3.bf16.msra.mxu1 %v801_v17 }
  0x31   : > { %v325_v38 = vsub.f32 %v315_v30, %v324_v35  ;;  %v348_v39 = vmul.f32 %v716_v27, %v346_v36  ;;  %v349_v40 = vmul.f32 %v717_v28, %v346_v36  ;;  %v350_v41 = vmul.f32 %v720_v29, %v346_v36 }
  0x32   : > { %v351_v42 = vmul.f32 %v721_v31, %v346_v36  ;;  %v352_v43 = vmul.f32 %v724_v32, %v346_v36  ;;  %v353_v44 = vmul.f32 %v725_v33, %v346_v36  ;;  %v354_v45 = vmul.f32 %v728_v34, %v346_v36 }
  0x33   : > { %v360_v46 = vrot.slane %v325_v38, %v345_v22  ;;  %v355_v47 = vmul.f32 %v729_v37, %v346_v36 }
  0x35   : > { %v362_v48 = vadd.f32 %v360_v46, %v348_v39  ;;  %v363_v49 = vadd.f32 %v360_v46, %v349_v40  ;;  %v364_v50 = vadd.f32 %v360_v46, %v350_v41  ;;  %v365_v51 = vadd.f32 %v360_v46, %v351_v42 }
  0x36   : > { %v366_v52 = vadd.f32 %v360_v46, %v352_v43  ;;  %v367_v53 = vadd.f32 %v360_v46, %v353_v44  ;;  %v368_v54 = vadd.f32 %v360_v46, %v354_v45  ;;  %v369_v55 = vadd.f32 %v360_v46, %v355_v47 }
  0x37   : > { %v370_v56 = vmax.f32 %v362_v48, 0.0  ;;  %v371_v57 = vmax.f32 %v363_v49, 0.0  ;;  %v372_v58 = vmax.f32 %v364_v50, 0.0  ;;  %v373_v59 = vmax.f32 %v365_v51, 0.0 }
  0x38   : > { %v374_v60 = vmax.f32 %v366_v52, 0.0  ;;  %v375_v61 = vmax.f32 %v367_v53, 0.0  ;;  %v376_v62 = vmax.f32 %v368_v54, 0.0  ;;  %v377_v63 = vmax.f32 %v369_v55, 0.0 }
  0x39   : > { %v378_v0 = vpack.c.bf16 %v371_v57, %v370_v56  ;;  %v379_v1 = vpack.c.bf16 %v373_v59, %v372_v58 }
  0x3a   : > { %v380_v2 = vpack.c.bf16 %v375_v61, %v374_v60  ;;  %v381_v3 = vpack.c.bf16 %v377_v63, %v376_v62 }
  0x3b   : > { %761 = vmatprep.mubr.bf16.mxu0 %v378_v0 }
  0x3c   : > { %762 = vmatmul.mubr.bf16.vlgmr.msra.gmra.mxu0 %v379_v1  ;;  %765 = vmatprep.mubr.bf16.mxu1 %v380_v2 }
  0x3d   : > { %766 = vmatmul.mubr.bf16.vlgmr.msra.gmra.mxu1 %v381_v3  ;;  %v552_v3 = vld [vmem:[%s976_s7] sm:$0x1] }
  0xfc   : > { %v763_v4 = vpop.f32.mrf.mxu0 }
  0xfd   : > { %v708_v5 = vpack.c.bf16 %v763_v4, %v763_v4  ;;  %v767_v6 = vpop.f32.mrf.mxu1  ;;  %v581_v16 = vmul.f32 %v763_v4, %v763_v4  ;;  %v557_v26 = vsel %vm553_vm2, %v763_v4, 0.0 }
  0xfe   : > { %v480_v7 = vpop.f32.mrf.mxu0  ;;  %v712_v8 = vpack.c.bf16 %v767_v6, %v767_v6  ;;  %v585_v42 = vmul.f32 %v767_v6, %v767_v6  ;;  %v565_v47 = vsel %vm553_vm2, %v767_v6, 0.0  ;;  %v578_v6 = vld [vmem:[%s977_s8] sm:$0x1] }
  0xff   : > { %546 = vst.msk [vmem:[%s874_s14 + $0x8] sm:$0xf] %vm543_vm1, %v708_v5  ;;  %v706_v9 = vpack.c.bf16 %v480_v7, %v480_v7  ;;  %v496_v10 = vpop.f32.mrf.mxu1  ;;  %v579_v13 = vmul.f32 %v480_v7, %v480_v7  ;;  %v554_v19 = vsel %vm553_vm2, %v480_v7, 0.0  ;;  %v590_v32 = vsel %vm553_vm2, %v581_v16, 0.0 }
 0x100   : > { %550 = vst.msk [vmem:[%s874_s14 + $0x18] sm:$0xf] %vm543_vm1, %v712_v8  ;;  %v764_v11 = vpop.f32.mrf.mxu0  ;;  %v710_v12 = vpack.c.bf16 %v496_v10, %v496_v10  ;;  %v583_v34 = vmul.f32 %v496_v10, %v496_v10  ;;  %v561_v38 = vsel %vm553_vm2, %v496_v10, 0.0  ;;  %v598_v52 = vsel %vm553_vm2, %v585_v42, 0.0 }
 0x101   : > { %544 = vst.msk [vmem:[%s874_s14] sm:$0xf] %vm543_vm1, %v706_v9  ;;  %v709_v14 = vpack.c.bf16 %v764_v11, %v764_v11  ;;  %v768_v15 = vpop.f32.mrf.mxu1  ;;  %v587_v27 = vsel %vm553_vm2, %v579_v13, 0.0  ;;  %v582_v28 = vmul.f32 %v764_v11, %v764_v11  ;;  %v559_v33 = vsel %vm553_vm2, %v764_v11, 0.0 }
 0x102   : > { %548 = vst.msk [vmem:[%s874_s14 + $0x10] sm:$0xf] %vm543_vm1, %v710_v12  ;;  %v483_v17 = vpop.f32.mrf.mxu0  ;;  %v713_v18 = vpack.c.bf16 %v768_v15, %v768_v15  ;;  %v594_v43 = vsel %vm553_vm2, %v583_v34, 0.0  ;;  %v586_v48 = vmul.f32 %v768_v15, %v768_v15  ;;  %v567_v53 = vsel %vm553_vm2, %v768_v15, 0.0 }
 0x103   : > { %547 = vst.msk [vmem:[%s874_s14 + $0xc] sm:$0xf] %vm543_vm1, %v709_v14  ;;  %v707_v20 = vpack.c.bf16 %v483_v17, %v483_v17  ;;  %v555_v21 = vsel %vm553_vm2, %v483_v17, 0.0  ;;  %v580_v22 = vmul.f32 %v483_v17, %v483_v17  ;;  %v499_v23 = vpop.f32.mrf.mxu1  ;;  %v592_v37 = vsel %vm553_vm2, %v582_v28, 0.0 }
 0x104   : > { %v556_v24 = vadd.f32 %v555_v21, %v554_v19  ;;  %551 = vst.msk [vmem:[%s874_s14 + $0x1c] sm:$0xf] %vm543_vm1, %v713_v18  ;;  %v711_v25 = vpack.c.bf16 %v499_v23, %v499_v23  ;;  %v584_v39 = vmul.f32 %v499_v23, %v499_v23  ;;  %v563_v44 = vsel %vm553_vm2, %v499_v23, 0.0 }
 0x105   : > { %545 = vst.msk [vmem:[%s874_s14 + $0x4] sm:$0xf] %vm543_vm1, %v707_v20  ;;  %v588_v29 = vsel %vm553_vm2, %v580_v22, 0.0  ;;  %v600_v56 = vsel %vm553_vm2, %v586_v48, 0.0 }
 0x106   : > { %v558_v30 = vadd.f32 %v557_v26, %v556_v24  ;;  %v589_v31 = vadd.f32 %v588_v29, %v587_v27  ;;  %549 = vst.msk [vmem:[%s874_s14 + $0x14] sm:$0xf] %vm543_vm1, %v711_v25  ;;  %v596_v49 = vsel %vm553_vm2, %v584_v39, 0.0 }
 0x108   : > { %v591_v35 = vadd.f32 %v590_v32, %v589_v31  ;;  %v560_v36 = vadd.f32 %v559_v33, %v558_v30 }
 0x10a   : > { %v562_v40 = vadd.f32 %v561_v38, %v560_v36  ;;  %v593_v41 = vadd.f32 %v592_v37, %v591_v35 }
 0x10c   : > { %v564_v45 = vadd.f32 %v563_v44, %v562_v40  ;;  %v595_v46 = vadd.f32 %v594_v43, %v593_v41 }
 0x10e   : > { %v566_v50 = vadd.f32 %v565_v47, %v564_v45  ;;  %v597_v51 = vadd.f32 %v596_v49, %v595_v46 }
 0x110   : > { %v568_v54 = vadd.f32 %v567_v53, %v566_v50  ;;  %v599_v55 = vadd.f32 %v598_v52, %v597_v51 }
 0x112   : > { %v569_v57 = vrot.slane %v568_v54, 4  ;;  %v601_v58 = vadd.f32 %v600_v56, %v599_v55 }
 0x114   : > { %v570_v59 = vadd.f32 %v569_v57, %v568_v54  ;;  %v602_v60 = vrot.slane %v601_v58, 4 }
 0x116   : > { %v571_v61 = vrot.slane %v570_v59, 2  ;;  %v603_v62 = vadd.f32 %v602_v60, %v601_v58 }
 0x118   : > { %v572_v63 = vadd.f32 %v571_v61, %v570_v59  ;;  %v604_v0 = vrot.slane %v603_v62, 2 }
 0x11a   : > { %v573_v1 = vrot.slane %v572_v63, 1  ;;  %v605_v2 = vadd.f32 %v604_v0, %v603_v62 }
 0x11c   : > { %v574_v4 = vadd.f32 %v573_v1, %v572_v63  ;;  %v606_v5 = vrot.slane %v605_v2, 1 }
 0x11e   : > { %v575_v7 = vadd.f32 %v574_v4, %v552_v3  ;;  %v607_v8 = vadd.f32 %v606_v5, %v605_v2 }
 0x120   : > { %577 = vst.msk [vmem:[%s976_s7] sm:$0x1] %vm576_vm3, %v575_v7  ;;  %v608_v9 = vadd.f32 %v607_v8, %v578_v6 }
 0x122   : > { %609 = vst.msk [vmem:[%s977_s8] sm:$0x1] %vm576_vm3, %v608_v9 }
 0x123 PF: > { %s19_s27 = sadd.s32 1, %s810_s27  }
 0x124   : > { %p16_p5 = scmp.ge.s32.totalorder %s19_s27, 6  }
 0x126   :  { %18 = sbr.rel (!%p16_p5) target bundleno = 1 (0x1), region = 94 }

</bundles_post_ra>
